<compile_context>
chip_gen: v7x
topology: tpu7x:2x2x1
jax: 0.10.0
libtpu: 0.0.40
codegen_flags: <defaults>
</compile_context>

<pallas_src>
import functools

import jax
import jax.numpy as jnp
from jax.experimental import pallas as pl
from jax.experimental.pallas import tpu as pltpu

# ---- model hyper-parameters (small, consistent with the module) ------------
D_MODEL = 32
N_HEADS = 4
N_LAYERS = 2
FFN_HIDDEN = 64
SEQ = 8
BATCH = 2
D_K = D_MODEL // N_HEADS
D_V = D_MODEL // N_HEADS
LN_EPS = 1e-5


def _layer_norm(x, gamma, beta):
    mu = jnp.mean(x, axis=-1, keepdims=True)
    var = jnp.mean((x - mu) ** 2, axis=-1, keepdims=True)
    return (x - mu) * jax.lax.rsqrt(var + LN_EPS) * gamma + beta


# ---------------------------------------------------------------------------
# Pallas kernel: the FULL encoder stack (all layers, whole batch), one call.
# ---------------------------------------------------------------------------
def encoder_kernel(x_ref, neg_ref, wqkv_ref, wo_ref, w1_ref, w2_ref, rv_ref,
                   out_ref, *, n_heads, n_layers, batch, seq):
    H, L, B, S = n_heads, n_layers, batch, seq
    BS, D = x_ref.shape
    Dk = D // H
    BH = B * H
    F = w1_ref.shape[2]

    x = x_ref[...].astype(jnp.float32)          # (B*S, D)
    neg_n = neg_ref[...]                        # (B*H, 1, S) additive key mask

    def split_heads(t):
        # (B*S, D) lane slice -> head-batched (B*H, S, Dk); the permutation is
        # minor-dim preserving (Dk stays on lanes).
        return t.reshape(B, S, H, Dk).transpose(0, 2, 1, 3).reshape(BH, S, Dk)

    # Static layer loop (L=2).  If N_LAYERS grows, switch to lax.fori_loop over
    # the stacked leading dim to bound vreg live ranges.
    for l in range(L):
        rv = rv_ref[l]                          # (8, W) packed row-vector params
        bqkv = rv[0:1, 0:3 * D]
        b1 = rv[1:2, 0:F]
        bo = rv[2:3, 0:D]
        b2 = rv[3:4, 0:D]
        g1 = rv[4:5, 0:D]
        be1 = rv[5:6, 0:D]
        g2 = rv[6:7, 0:D]
        be2 = rv[7:8, 0:D]

        # --- fused QKV projection: one MXU push per layer -------------------
        qkv = jnp.dot(x, wqkv_ref[l], preferred_element_type=jnp.float32) + bqkv

        # 32-aligned lane slices; attention scale already folded into wq/bq.
        qh = split_heads(qkv[:, 0:D])
        kh = split_heads(qkv[:, D:2 * D])
        vh = split_heads(qkv[:, 2 * D:3 * D])

        # --- head-batched attention: one softmax + one context matmul -------
        scores = jnp.einsum('nqd,nkd->nqk', qh, kh,
                            preferred_element_type=jnp.float32) + neg_n  # (B*H,S,S)
        scores = scores - jnp.max(scores, axis=-1, keepdims=True)
        p = jnp.exp(scores)
        # EUP approximate reciprocal instead of a VALU divide.
        p = p * pl.reciprocal(jnp.sum(p, axis=-1, keepdims=True), approx=True)
        ctx = jnp.einsum('nqk,nkd->nqd', p, vh,
                         preferred_element_type=jnp.float32)             # (B*H,S,Dk)
        # Merge heads back onto the lane axis and re-fold the batch.
        ctx = ctx.reshape(B, H, S, Dk).transpose(0, 2, 1, 3).reshape(BS, D)

        att = jnp.dot(ctx, wo_ref[l], preferred_element_type=jnp.float32) + bo

        # --- residual + layernorm 1 -----------------------------------------
        h1 = _layer_norm(x + att, g1, be1)

        # --- feed-forward ----------------------------------------------------
        f = jnp.dot(h1, w1_ref[l], preferred_element_type=jnp.float32) + b1
        f = jnp.maximum(f, 0.0)
        f = jnp.dot(f, w2_ref[l], preferred_element_type=jnp.float32) + b2
        # TODO(synk): dropout is identity (eval/inference forward only).

        # --- residual + layernorm 2 -----------------------------------------
        x = _layer_norm(h1 + f, g2, be2)

    out_ref[...] = x.astype(out_ref.dtype)


# ---------------------------------------------------------------------------
# Wrapper: fuse QKV, pack row-vector params, fold batch, single pallas_call.
# ---------------------------------------------------------------------------
def encoder(x, mask, params_per_layer):
    """x: (B, S, D) f32; mask: (B, S) with 1 = valid, 0 = padded."""
    B, S, D = x.shape
    L = len(params_per_layer)
    H = N_HEADS
    Dk = D // H
    F = params_per_layer[0]["w1"].shape[1]
    scale = 1.0 / (Dk ** 0.5)
    W = max(3 * D, F)

    def fuse_qkv_w(p):
        # Fold the 1/sqrt(Dk) attention scale into the query projection.
        return jnp.concatenate([p["wq"] * scale, p["wk"], p["wv"]], axis=-1)

    def pack_rowvecs(p):
        rows = jnp.zeros((8, W), jnp.float32)
        bqkv = jnp.concatenate([p["bq"] * scale, p["bk"], p["bv"]], axis=-1)
        rows = rows.at[0:1, 0:3 * D].set(bqkv)
        rows = rows.at[1:2, 0:F].set(p["b1"])
        rows = rows.at[2:3, 0:D].set(p["bo"])
        rows = rows.at[3:4, 0:D].set(p["b2"])
        rows = rows.at[4:5, 0:D].set(p["g1"])
        rows = rows.at[5:6, 0:D].set(p["be1"])
        rows = rows.at[6:7, 0:D].set(p["g2"])
        rows = rows.at[7:8, 0:D].set(p["be2"])
        return rows

    wqkv = jnp.stack([fuse_qkv_w(p) for p in params_per_layer], axis=0)   # (L, D, 3D)
    wo = jnp.stack([p["wo"] for p in params_per_layer], axis=0)           # (L, D, D)
    w1 = jnp.stack([p["w1"] for p in params_per_layer], axis=0)           # (L, D, F)
    w2 = jnp.stack([p["w2"] for p in params_per_layer], axis=0)           # (L, F, D)
    rowvec = jnp.stack([pack_rowvecs(p) for p in params_per_layer], axis=0)  # (L, 8, W)

    # Additive key mask, expanded to the head-batched layout once (free here).
    neg = jnp.where(mask.astype(jnp.float32) > 0.5, 0.0, -1e9).astype(jnp.float32)
    neg_n = jnp.repeat(neg[:, None, :], H, axis=0)                        # (B*H, 1, S)

    x_flat = x.reshape(B * S, D)   # fold batch into the matmul M dimension

    kernel = functools.partial(encoder_kernel, n_heads=H, n_layers=L,
                               batch=B, seq=S)

    def vmem():
        return pl.BlockSpec(memory_space=pltpu.MemorySpace.VMEM)

    out_flat = pl.pallas_call(
        kernel,
        out_shape=jax.ShapeDtypeStruct((B * S, D), x.dtype),
        in_specs=[vmem() for _ in range(7)],
        out_specs=vmem(),
    )(x_flat, neg_n, wqkv, wo, w1, w2, rowvec)

    return out_flat.reshape(B, S, D)


# ---------------------------------------------------------------------------
# Deterministic parameter init + pure-JAX reference for correctness check.
# ---------------------------------------------------------------------------
def init_layer_params(key):
    keys = jax.random.split(key, 8)
    s = 0.1
    return {
        "wq": s * jax.random.normal(keys[0], (D_MODEL, N_HEADS * D_K), jnp.float32),
        "bq": jnp.zeros((1, N_HEADS * D_K), jnp.float32),
        "wk": s * jax.random.normal(keys[1], (D_MODEL, N_HEADS * D_K), jnp.float32),
        "bk": jnp.zeros((1, N_HEADS * D_K), jnp.float32),
        "wv": s * jax.random.normal(keys[2], (D_MODEL, N_HEADS * D_V), jnp.float32),
        "bv": jnp.zeros((1, N_HEADS * D_V), jnp.float32),
        "wo": s * jax.random.normal(keys[3], (N_HEADS * D_V, D_MODEL), jnp.float32),
        "bo": jnp.zeros((1, D_MODEL), jnp.float32),
        "g1": jnp.ones((1, D_MODEL), jnp.float32),
        "be1": jnp.zeros((1, D_MODEL), jnp.float32),
        "w1": s * jax.random.normal(keys[4], (D_MODEL, FFN_HIDDEN), jnp.float32),
        "b1": 0.01 * jnp.ones((1, FFN_HIDDEN), jnp.float32),
        "w2": s * jax.random.normal(keys[5], (FFN_HIDDEN, D_MODEL), jnp.float32),
        "b2": 0.01 * jnp.ones((1, D_MODEL), jnp.float32),
        "g2": jnp.ones((1, D_MODEL), jnp.float32),
        "be2": jnp.zeros((1, D_MODEL), jnp.float32),
    }


def reference_layer(x, mask, p):
    neg = jnp.where(mask > 0.5, 0.0, -1e9)                     # (B, S)
    q = x @ p["wq"] + p["bq"][0]
    k = x @ p["wk"] + p["bk"][0]
    v = x @ p["wv"] + p["bv"][0]
    B, S, _ = x.shape
    qh = q.reshape(B, S, N_HEADS, D_K).transpose(0, 2, 1, 3)
    kh = k.reshape(B, S, N_HEADS, D_K).transpose(0, 2, 1, 3)
    vh = v.reshape(B, S, N_HEADS, D_V).transpose(0, 2, 1, 3)
    scores = jnp.einsum("bhqd,bhkd->bhqk", qh, kh) / (D_K ** 0.5)
    scores = scores + neg[:, None, None, :]
    attn = jax.nn.softmax(scores, axis=-1)
    ctx = jnp.einsum("bhqk,bhkd->bhqd", attn, vh)
    ctx = ctx.transpose(0, 2, 1, 3).reshape(B, S, N_HEADS * D_V)
    att = ctx @ p["wo"] + p["bo"][0]
    h1 = _layer_norm(x + att, p["g1"][0], p["be1"][0])
    f = jnp.maximum(h1 @ p["w1"] + p["b1"][0], 0.0) @ p["w2"] + p["b2"][0]
    return _layer_norm(h1 + f, p["g2"][0], p["be2"][0])


def reference_encoder(x, mask, params_per_layer):
    m = mask.astype(jnp.float32)
    for p in params_per_layer:
        x = reference_layer(x, m, p)
    return x


if __name__ == "__main__":
    key = jax.random.PRNGKey(0)
    kx, kp = jax.random.split(key)
    x = jax.random.normal(kx, (BATCH, SEQ, D_MODEL), jnp.float32)
    # padding mask: 1 = valid token, 0 = padded (last two tokens of batch 1 padded)
    mask = jnp.ones((BATCH, SEQ), jnp.float32).at[1, -2:].set(0.0)

    layer_keys = jax.random.split(kp, N_LAYERS)
    params = [init_layer_params(k) for k in layer_keys]

    out = encoder(x, mask, params)
    out = jax.block_until_ready(out)

    ref = reference_encoder(x, mask, params)
    assert out.shape == (BATCH, SEQ, D_MODEL)
    # Tolerance absorbs the EUP approximate reciprocal used for the softmax
    # denominator (pl.reciprocal(..., approx=True)); matmuls stay f32.
    assert jnp.allclose(out, ref, atol=5e-3, rtol=5e-3), "mismatch vs reference"

    print("KERNEL_OK")
</pallas_src>

<mosaic_0001>
module attributes {stable_mosaic.version = 11 : i64} {
  func.func @encoder_kernel(%arg0: memref<16x32xf32, #tpu.memory_space<vmem>>, %arg1: memref<8x1x8xf32, #tpu.memory_space<vmem>>, %arg2: memref<2x32x96xf32, #tpu.memory_space<vmem>>, %arg3: memref<2x32x32xf32, #tpu.memory_space<vmem>>, %arg4: memref<2x32x64xf32, #tpu.memory_space<vmem>>, %arg5: memref<2x64x32xf32, #tpu.memory_space<vmem>>, %arg6: memref<2x8x96xf32, #tpu.memory_space<vmem>>, %arg7: memref<16x32xf32, #tpu.memory_space<vmem>>) attributes {dimension_semantics = [], scalar_prefetch = 0 : i64, scratch_operands = 0 : i64, tpu.core_type = #tpu.core_type<tc>} {
    %c0 = arith.constant 0 : index
    %c0_0 = arith.constant 0 : index
    %0 = vector.load %arg0[%c0, %c0_0] : memref<16x32xf32, #tpu.memory_space<vmem>>, vector<16x32xf32>
    %c0_1 = arith.constant 0 : index
    %c0_2 = arith.constant 0 : index
    %c0_3 = arith.constant 0 : index
    %1 = vector.load %arg1[%c0_1, %c0_2, %c0_3] : memref<8x1x8xf32, #tpu.memory_space<vmem>>, vector<8x1x8xf32>
    %c0_4 = arith.constant 0 : index
    %c0_5 = arith.constant 0 : index
    %c0_6 = arith.constant 0 : index
    %2 = vector.load %arg6[%c0_4, %c0_5, %c0_6] : memref<2x8x96xf32, #tpu.memory_space<vmem>>, vector<1x8x96xf32>
    %3 = vector.shape_cast %2 : vector<1x8x96xf32> to vector<8x96xf32>
    %4 = vector.extract_strided_slice %3 {offsets = [0, 0], sizes = [1, 96], strides = [1, 1]} : vector<8x96xf32> to vector<1x96xf32>
    %5 = vector.extract_strided_slice %3 {offsets = [1, 0], sizes = [1, 64], strides = [1, 1]} : vector<8x96xf32> to vector<1x64xf32>
    %6 = vector.extract_strided_slice %3 {offsets = [2, 0], sizes = [1, 32], strides = [1, 1]} : vector<8x96xf32> to vector<1x32xf32>
    %7 = vector.extract_strided_slice %3 {offsets = [3, 0], sizes = [1, 32], strides = [1, 1]} : vector<8x96xf32> to vector<1x32xf32>
    %8 = vector.extract_strided_slice %3 {offsets = [4, 0], sizes = [1, 32], strides = [1, 1]} : vector<8x96xf32> to vector<1x32xf32>
    %9 = vector.extract_strided_slice %3 {offsets = [5, 0], sizes = [1, 32], strides = [1, 1]} : vector<8x96xf32> to vector<1x32xf32>
    %10 = vector.extract_strided_slice %3 {offsets = [6, 0], sizes = [1, 32], strides = [1, 1]} : vector<8x96xf32> to vector<1x32xf32>
    %11 = vector.extract_strided_slice %3 {offsets = [7, 0], sizes = [1, 32], strides = [1, 1]} : vector<8x96xf32> to vector<1x32xf32>
    %c0_7 = arith.constant 0 : index
    %c0_8 = arith.constant 0 : index
    %c0_9 = arith.constant 0 : index
    %12 = vector.load %arg2[%c0_7, %c0_8, %c0_9] : memref<2x32x96xf32, #tpu.memory_space<vmem>>, vector<1x32x96xf32>
    %13 = vector.shape_cast %12 : vector<1x32x96xf32> to vector<32x96xf32>
    %cst = arith.constant dense<0.000000e+00> : vector<16x96xf32>
    %14 = tpu.matmul %0, %13, %cst {dimension_numbers = #tpu.dot_dimension_numbers<[1], [0], [0], [1], [0, 0, 1, 1], [], []>} : vector<16x32xf32>, vector<32x96xf32>, vector<16x96xf32> -> vector<16x96xf32>
    %15 = vector.broadcast %4 : vector<1x96xf32> to vector<16x96xf32>
    %16 = arith.addf %14, %15 : vector<16x96xf32>
    %17 = vector.extract_strided_slice %16 {offsets = [0, 0], sizes = [16, 32], strides = [1, 1]} : vector<16x96xf32> to vector<16x32xf32>
    %18 = vector.shape_cast %17 : vector<16x32xf32> to vector<2x8x4x8xf32>
    %19 = tpu.transpose %18, [0, 2, 1, 3] : vector<2x8x4x8xf32> -> vector<2x4x8x8xf32>
    %20 = vector.shape_cast %19 : vector<2x4x8x8xf32> to vector<8x8x8xf32>
    %21 = vector.extract_strided_slice %16 {offsets = [0, 32], sizes = [16, 32], strides = [1, 1]} : vector<16x96xf32> to vector<16x32xf32>
    %22 = vector.shape_cast %21 : vector<16x32xf32> to vector<2x8x4x8xf32>
    %23 = tpu.transpose %22, [0, 2, 1, 3] : vector<2x8x4x8xf32> -> vector<2x4x8x8xf32>
    %24 = vector.shape_cast %23 : vector<2x4x8x8xf32> to vector<8x8x8xf32>
    %25 = vector.extract_strided_slice %16 {offsets = [0, 64], sizes = [16, 32], strides = [1, 1]} : vector<16x96xf32> to vector<16x32xf32>
    %26 = vector.shape_cast %25 : vector<16x32xf32> to vector<2x8x4x8xf32>
    %27 = tpu.transpose %26, [0, 2, 1, 3] : vector<2x8x4x8xf32> -> vector<2x4x8x8xf32>
    %28 = vector.shape_cast %27 : vector<2x4x8x8xf32> to vector<8x8x8xf32>
    "tpu.trace_start"() <{level = 10 : i32, message = "nqd,nkd->nqk"}> : () -> ()
    %cst_10 = arith.constant dense<0.000000e+00> : vector<8x8x8xf32>
    %29 = tpu.matmul %20, %24, %cst_10 {dimension_numbers = #tpu.dot_dimension_numbers<[2], [2], [1], [1], [0, 0, 0, 1, 1, 1], [0], [0]>} : vector<8x8x8xf32>, vector<8x8x8xf32>, vector<8x8x8xf32> -> vector<8x8x8xf32>
    "tpu.trace_stop"() : () -> ()
    %30 = vector.broadcast %1 : vector<8x1x8xf32> to vector<8x8x8xf32>
    %31 = arith.addf %29, %30 : vector<8x8x8xf32>
    %cst_11 = arith.constant dense<0xFF800000> : vector<8x8xf32>
    %32 = vector.multi_reduction <maximumf>, %31, %cst_11 [2] : vector<8x8x8xf32> to vector<8x8xf32>
    %33 = vector.shape_cast %32 : vector<8x8xf32> to vector<8x8x1xf32>
    %34 = vector.broadcast %33 : vector<8x8x1xf32> to vector<8x8x8xf32>
    %35 = arith.subf %31, %34 : vector<8x8x8xf32>
    %36 = math.exp %35 : vector<8x8x8xf32>
    %cst_12 = arith.constant dense<0.000000e+00> : vector<8x8xf32>
    %37 = vector.multi_reduction <add>, %36, %cst_12 [2] : vector<8x8x8xf32> to vector<8x8xf32>
    %38 = vector.shape_cast %37 : vector<8x8xf32> to vector<8x8x1xf32>
    %39 = tpu.reciprocal %38 {approx = true} : vector<8x8x1xf32> -> vector<8x8x1xf32>
    %40 = vector.broadcast %39 : vector<8x8x1xf32> to vector<8x8x8xf32>
    %41 = arith.mulf %36, %40 : vector<8x8x8xf32>
    "tpu.trace_start"() <{level = 10 : i32, message = "nqk,nkd->nqd"}> : () -> ()
    %cst_13 = arith.constant dense<0.000000e+00> : vector<8x8x8xf32>
    %42 = tpu.matmul %41, %28, %cst_13 {dimension_numbers = #tpu.dot_dimension_numbers<[2], [1], [1], [2], [0, 0, 0, 1, 1, 2], [0], [0]>} : vector<8x8x8xf32>, vector<8x8x8xf32>, vector<8x8x8xf32> -> vector<8x8x8xf32>
    "tpu.trace_stop"() : () -> ()
    %43 = vector.shape_cast %42 : vector<8x8x8xf32> to vector<2x4x8x8xf32>
    %44 = tpu.transpose %43, [0, 2, 1, 3] : vector<2x4x8x8xf32> -> vector<2x8x4x8xf32>
    %45 = vector.shape_cast %44 : vector<2x8x4x8xf32> to vector<16x32xf32>
    %c0_14 = arith.constant 0 : index
    %c0_15 = arith.constant 0 : index
    %c0_16 = arith.constant 0 : index
    %46 = vector.load %arg3[%c0_14, %c0_15, %c0_16] : memref<2x32x32xf32, #tpu.memory_space<vmem>>, vector<1x32x32xf32>
    %47 = vector.shape_cast %46 : vector<1x32x32xf32> to vector<32x32xf32>
    %cst_17 = arith.constant dense<0.000000e+00> : vector<16x32xf32>
    %48 = tpu.matmul %45, %47, %cst_17 {dimension_numbers = #tpu.dot_dimension_numbers<[1], [0], [0], [1], [0, 0, 1, 1], [], []>} : vector<16x32xf32>, vector<32x32xf32>, vector<16x32xf32> -> vector<16x32xf32>
    %49 = vector.broadcast %6 : vector<1x32xf32> to vector<16x32xf32>
    %50 = arith.addf %48, %49 : vector<16x32xf32>
    %51 = arith.addf %0, %50 : vector<16x32xf32>
    %cst_18 = arith.constant dense<0.000000e+00> : vector<16xf32>
    %52 = vector.multi_reduction <add>, %51, %cst_18 [1] : vector<16x32xf32> to vector<16xf32>
    %53 = vector.shape_cast %52 : vector<16xf32> to vector<16x1xf32>
    %cst_19 = arith.constant 3.200000e+01 : f32
    %54 = vector.broadcast %cst_19 : f32 to vector<16x1xf32>
    %55 = arith.divf %53, %54 : vector<16x1xf32>
    %56 = vector.broadcast %55 : vector<16x1xf32> to vector<16x32xf32>
    %57 = arith.subf %51, %56 : vector<16x32xf32>
    %58 = arith.mulf %57, %57 : vector<16x32xf32>
    %cst_20 = arith.constant dense<0.000000e+00> : vector<16xf32>
    %59 = vector.multi_reduction <add>, %58, %cst_20 [1] : vector<16x32xf32> to vector<16xf32>
    %60 = vector.shape_cast %59 : vector<16xf32> to vector<16x1xf32>
    %cst_21 = arith.constant 3.200000e+01 : f32
    %61 = vector.broadcast %cst_21 : f32 to vector<16x1xf32>
    %62 = arith.divf %60, %61 : vector<16x1xf32>
    %63 = vector.broadcast %55 : vector<16x1xf32> to vector<16x32xf32>
    %64 = arith.subf %51, %63 : vector<16x32xf32>
    %cst_22 = arith.constant 9.99999974E-6 : f32
    %65 = vector.broadcast %cst_22 : f32 to vector<16x1xf32>
    %66 = arith.addf %62, %65 : vector<16x1xf32>
    %67 = math.rsqrt %66 : vector<16x1xf32>
    %68 = vector.broadcast %67 : vector<16x1xf32> to vector<16x32xf32>
    %69 = arith.mulf %64, %68 : vector<16x32xf32>
    %70 = vector.broadcast %8 : vector<1x32xf32> to vector<16x32xf32>
    %71 = arith.mulf %69, %70 : vector<16x32xf32>
    %72 = vector.broadcast %9 : vector<1x32xf32> to vector<16x32xf32>
    %73 = arith.addf %71, %72 : vector<16x32xf32>
    %c0_23 = arith.constant 0 : index
    %c0_24 = arith.constant 0 : index
    %c0_25 = arith.constant 0 : index
    %74 = vector.load %arg4[%c0_23, %c0_24, %c0_25] : memref<2x32x64xf32, #tpu.memory_space<vmem>>, vector<1x32x64xf32>
    %75 = vector.shape_cast %74 : vector<1x32x64xf32> to vector<32x64xf32>
    %cst_26 = arith.constant dense<0.000000e+00> : vector<16x64xf32>
    %76 = tpu.matmul %73, %75, %cst_26 {dimension_numbers = #tpu.dot_dimension_numbers<[1], [0], [0], [1], [0, 0, 1, 1], [], []>} : vector<16x32xf32>, vector<32x64xf32>, vector<16x64xf32> -> vector<16x64xf32>
    %77 = vector.broadcast %5 : vector<1x64xf32> to vector<16x64xf32>
    %78 = arith.addf %76, %77 : vector<16x64xf32>
    %cst_27 = arith.constant 0.000000e+00 : f32
    %79 = vector.broadcast %cst_27 : f32 to vector<16x64xf32>
    %80 = arith.maximumf %78, %79 : vector<16x64xf32>
    %c0_28 = arith.constant 0 : index
    %c0_29 = arith.constant 0 : index
    %c0_30 = arith.constant 0 : index
    %81 = vector.load %arg5[%c0_28, %c0_29, %c0_30] : memref<2x64x32xf32, #tpu.memory_space<vmem>>, vector<1x64x32xf32>
    %82 = vector.shape_cast %81 : vector<1x64x32xf32> to vector<64x32xf32>
    %cst_31 = arith.constant dense<0.000000e+00> : vector<16x32xf32>
    %83 = tpu.matmul %80, %82, %cst_31 {dimension_numbers = #tpu.dot_dimension_numbers<[1], [0], [0], [1], [0, 0, 1, 1], [], []>} : vector<16x64xf32>, vector<64x32xf32>, vector<16x32xf32> -> vector<16x32xf32>
    %84 = vector.broadcast %7 : vector<1x32xf32> to vector<16x32xf32>
    %85 = arith.addf %83, %84 : vector<16x32xf32>
    %86 = arith.addf %73, %85 : vector<16x32xf32>
    %cst_32 = arith.constant dense<0.000000e+00> : vector<16xf32>
    %87 = vector.multi_reduction <add>, %86, %cst_32 [1] : vector<16x32xf32> to vector<16xf32>
    %88 = vector.shape_cast %87 : vector<16xf32> to vector<16x1xf32>
    %cst_33 = arith.constant 3.200000e+01 : f32
    %89 = vector.broadcast %cst_33 : f32 to vector<16x1xf32>
    %90 = arith.divf %88, %89 : vector<16x1xf32>
    %91 = vector.broadcast %90 : vector<16x1xf32> to vector<16x32xf32>
    %92 = arith.subf %86, %91 : vector<16x32xf32>
    %93 = arith.mulf %92, %92 : vector<16x32xf32>
    %cst_34 = arith.constant dense<0.000000e+00> : vector<16xf32>
    %94 = vector.multi_reduction <add>, %93, %cst_34 [1] : vector<16x32xf32> to vector<16xf32>
    %95 = vector.shape_cast %94 : vector<16xf32> to vector<16x1xf32>
    %cst_35 = arith.constant 3.200000e+01 : f32
    %96 = vector.broadcast %cst_35 : f32 to vector<16x1xf32>
    %97 = arith.divf %95, %96 : vector<16x1xf32>
    %98 = vector.broadcast %90 : vector<16x1xf32> to vector<16x32xf32>
    %99 = arith.subf %86, %98 : vector<16x32xf32>
    %cst_36 = arith.constant 9.99999974E-6 : f32
    %100 = vector.broadcast %cst_36 : f32 to vector<16x1xf32>
    %101 = arith.addf %97, %100 : vector<16x1xf32>
    %102 = math.rsqrt %101 : vector<16x1xf32>
    %103 = vector.broadcast %102 : vector<16x1xf32> to vector<16x32xf32>
    %104 = arith.mulf %99, %103 : vector<16x32xf32>
    %105 = vector.broadcast %10 : vector<1x32xf32> to vector<16x32xf32>
    %106 = arith.mulf %104, %105 : vector<16x32xf32>
    %107 = vector.broadcast %11 : vector<1x32xf32> to vector<16x32xf32>
    %108 = arith.addf %106, %107 : vector<16x32xf32>
    %c1 = arith.constant 1 : index
    %c0_37 = arith.constant 0 : index
    %c0_38 = arith.constant 0 : index
    %109 = vector.load %arg6[%c1, %c0_37, %c0_38] : memref<2x8x96xf32, #tpu.memory_space<vmem>>, vector<1x8x96xf32>
    %110 = vector.shape_cast %109 : vector<1x8x96xf32> to vector<8x96xf32>
    %111 = vector.extract_strided_slice %110 {offsets = [0, 0], sizes = [1, 96], strides = [1, 1]} : vector<8x96xf32> to vector<1x96xf32>
    %112 = vector.extract_strided_slice %110 {offsets = [1, 0], sizes = [1, 64], strides = [1, 1]} : vector<8x96xf32> to vector<1x64xf32>
    %113 = vector.extract_strided_slice %110 {offsets = [2, 0], sizes = [1, 32], strides = [1, 1]} : vector<8x96xf32> to vector<1x32xf32>
    %114 = vector.extract_strided_slice %110 {offsets = [3, 0], sizes = [1, 32], strides = [1, 1]} : vector<8x96xf32> to vector<1x32xf32>
    %115 = vector.extract_strided_slice %110 {offsets = [4, 0], sizes = [1, 32], strides = [1, 1]} : vector<8x96xf32> to vector<1x32xf32>
    %116 = vector.extract_strided_slice %110 {offsets = [5, 0], sizes = [1, 32], strides = [1, 1]} : vector<8x96xf32> to vector<1x32xf32>
    %117 = vector.extract_strided_slice %110 {offsets = [6, 0], sizes = [1, 32], strides = [1, 1]} : vector<8x96xf32> to vector<1x32xf32>
    %118 = vector.extract_strided_slice %110 {offsets = [7, 0], sizes = [1, 32], strides = [1, 1]} : vector<8x96xf32> to vector<1x32xf32>
    %c1_39 = arith.constant 1 : index
    %c0_40 = arith.constant 0 : index
    %c0_41 = arith.constant 0 : index
    %119 = vector.load %arg2[%c1_39, %c0_40, %c0_41] : memref<2x32x96xf32, #tpu.memory_space<vmem>>, vector<1x32x96xf32>
    %120 = vector.shape_cast %119 : vector<1x32x96xf32> to vector<32x96xf32>
    %cst_42 = arith.constant dense<0.000000e+00> : vector<16x96xf32>
    %121 = tpu.matmul %108, %120, %cst_42 {dimension_numbers = #tpu.dot_dimension_numbers<[1], [0], [0], [1], [0, 0, 1, 1], [], []>} : vector<16x32xf32>, vector<32x96xf32>, vector<16x96xf32> -> vector<16x96xf32>
    %122 = vector.broadcast %111 : vector<1x96xf32> to vector<16x96xf32>
    %123 = arith.addf %121, %122 : vector<16x96xf32>
    %124 = vector.extract_strided_slice %123 {offsets = [0, 0], sizes = [16, 32], strides = [1, 1]} : vector<16x96xf32> to vector<16x32xf32>
    %125 = vector.shape_cast %124 : vector<16x32xf32> to vector<2x8x4x8xf32>
    %126 = tpu.transpose %125, [0, 2, 1, 3] : vector<2x8x4x8xf32> -> vector<2x4x8x8xf32>
    %127 = vector.shape_cast %126 : vector<2x4x8x8xf32> to vector<8x8x8xf32>
    %128 = vector.extract_strided_slice %123 {offsets = [0, 32], sizes = [16, 32], strides = [1, 1]} : vector<16x96xf32> to vector<16x32xf32>
    %129 = vector.shape_cast %128 : vector<16x32xf32> to vector<2x8x4x8xf32>
    %130 = tpu.transpose %129, [0, 2, 1, 3] : vector<2x8x4x8xf32> -> vector<2x4x8x8xf32>
    %131 = vector.shape_cast %130 : vector<2x4x8x8xf32> to vector<8x8x8xf32>
    %132 = vector.extract_strided_slice %123 {offsets = [0, 64], sizes = [16, 32], strides = [1, 1]} : vector<16x96xf32> to vector<16x32xf32>
    %133 = vector.shape_cast %132 : vector<16x32xf32> to vector<2x8x4x8xf32>
    %134 = tpu.transpose %133, [0, 2, 1, 3] : vector<2x8x4x8xf32> -> vector<2x4x8x8xf32>
    %135 = vector.shape_cast %134 : vector<2x4x8x8xf32> to vector<8x8x8xf32>
    "tpu.trace_start"() <{level = 10 : i32, message = "nqd,nkd->nqk"}> : () -> ()
    %cst_43 = arith.constant dense<0.000000e+00> : vector<8x8x8xf32>
    %136 = tpu.matmul %127, %131, %cst_43 {dimension_numbers = #tpu.dot_dimension_numbers<[2], [2], [1], [1], [0, 0, 0, 1, 1, 1], [0], [0]>} : vector<8x8x8xf32>, vector<8x8x8xf32>, vector<8x8x8xf32> -> vector<8x8x8xf32>
    "tpu.trace_stop"() : () -> ()
    %137 = vector.broadcast %1 : vector<8x1x8xf32> to vector<8x8x8xf32>
    %138 = arith.addf %136, %137 : vector<8x8x8xf32>
    %cst_44 = arith.constant dense<0xFF800000> : vector<8x8xf32>
    %139 = vector.multi_reduction <maximumf>, %138, %cst_44 [2] : vector<8x8x8xf32> to vector<8x8xf32>
    %140 = vector.shape_cast %139 : vector<8x8xf32> to vector<8x8x1xf32>
    %141 = vector.broadcast %140 : vector<8x8x1xf32> to vector<8x8x8xf32>
    %142 = arith.subf %138, %141 : vector<8x8x8xf32>
    %143 = math.exp %142 : vector<8x8x8xf32>
    %cst_45 = arith.constant dense<0.000000e+00> : vector<8x8xf32>
    %144 = vector.multi_reduction <add>, %143, %cst_45 [2] : vector<8x8x8xf32> to vector<8x8xf32>
    %145 = vector.shape_cast %144 : vector<8x8xf32> to vector<8x8x1xf32>
    %146 = tpu.reciprocal %145 {approx = true} : vector<8x8x1xf32> -> vector<8x8x1xf32>
    %147 = vector.broadcast %146 : vector<8x8x1xf32> to vector<8x8x8xf32>
    %148 = arith.mulf %143, %147 : vector<8x8x8xf32>
    "tpu.trace_start"() <{level = 10 : i32, message = "nqk,nkd->nqd"}> : () -> ()
    %cst_46 = arith.constant dense<0.000000e+00> : vector<8x8x8xf32>
    %149 = tpu.matmul %148, %135, %cst_46 {dimension_numbers = #tpu.dot_dimension_numbers<[2], [1], [1], [2], [0, 0, 0, 1, 1, 2], [0], [0]>} : vector<8x8x8xf32>, vector<8x8x8xf32>, vector<8x8x8xf32> -> vector<8x8x8xf32>
    "tpu.trace_stop"() : () -> ()
    %150 = vector.shape_cast %149 : vector<8x8x8xf32> to vector<2x4x8x8xf32>
    %151 = tpu.transpose %150, [0, 2, 1, 3] : vector<2x4x8x8xf32> -> vector<2x8x4x8xf32>
    %152 = vector.shape_cast %151 : vector<2x8x4x8xf32> to vector<16x32xf32>
    %c1_47 = arith.constant 1 : index
    %c0_48 = arith.constant 0 : index
    %c0_49 = arith.constant 0 : index
    %153 = vector.load %arg3[%c1_47, %c0_48, %c0_49] : memref<2x32x32xf32, #tpu.memory_space<vmem>>, vector<1x32x32xf32>
    %154 = vector.shape_cast %153 : vector<1x32x32xf32> to vector<32x32xf32>
    %cst_50 = arith.constant dense<0.000000e+00> : vector<16x32xf32>
    %155 = tpu.matmul %152, %154, %cst_50 {dimension_numbers = #tpu.dot_dimension_numbers<[1], [0], [0], [1], [0, 0, 1, 1], [], []>} : vector<16x32xf32>, vector<32x32xf32>, vector<16x32xf32> -> vector<16x32xf32>
    %156 = vector.broadcast %113 : vector<1x32xf32> to vector<16x32xf32>
    %157 = arith.addf %155, %156 : vector<16x32xf32>
    %158 = arith.addf %108, %157 : vector<16x32xf32>
    %cst_51 = arith.constant dense<0.000000e+00> : vector<16xf32>
    %159 = vector.multi_reduction <add>, %158, %cst_51 [1] : vector<16x32xf32> to vector<16xf32>
    %160 = vector.shape_cast %159 : vector<16xf32> to vector<16x1xf32>
    %cst_52 = arith.constant 3.200000e+01 : f32
    %161 = vector.broadcast %cst_52 : f32 to vector<16x1xf32>
    %162 = arith.divf %160, %161 : vector<16x1xf32>
    %163 = vector.broadcast %162 : vector<16x1xf32> to vector<16x32xf32>
    %164 = arith.subf %158, %163 : vector<16x32xf32>
    %165 = arith.mulf %164, %164 : vector<16x32xf32>
    %cst_53 = arith.constant dense<0.000000e+00> : vector<16xf32>
    %166 = vector.multi_reduction <add>, %165, %cst_53 [1] : vector<16x32xf32> to vector<16xf32>
    %167 = vector.shape_cast %166 : vector<16xf32> to vector<16x1xf32>
    %cst_54 = arith.constant 3.200000e+01 : f32
    %168 = vector.broadcast %cst_54 : f32 to vector<16x1xf32>
    %169 = arith.divf %167, %168 : vector<16x1xf32>
    %170 = vector.broadcast %162 : vector<16x1xf32> to vector<16x32xf32>
    %171 = arith.subf %158, %170 : vector<16x32xf32>
    %cst_55 = arith.constant 9.99999974E-6 : f32
    %172 = vector.broadcast %cst_55 : f32 to vector<16x1xf32>
    %173 = arith.addf %169, %172 : vector<16x1xf32>
    %174 = math.rsqrt %173 : vector<16x1xf32>
    %175 = vector.broadcast %174 : vector<16x1xf32> to vector<16x32xf32>
    %176 = arith.mulf %171, %175 : vector<16x32xf32>
    %177 = vector.broadcast %115 : vector<1x32xf32> to vector<16x32xf32>
    %178 = arith.mulf %176, %177 : vector<16x32xf32>
    %179 = vector.broadcast %116 : vector<1x32xf32> to vector<16x32xf32>
    %180 = arith.addf %178, %179 : vector<16x32xf32>
    %c1_56 = arith.constant 1 : index
    %c0_57 = arith.constant 0 : index
    %c0_58 = arith.constant 0 : index
    %181 = vector.load %arg4[%c1_56, %c0_57, %c0_58] : memref<2x32x64xf32, #tpu.memory_space<vmem>>, vector<1x32x64xf32>
    %182 = vector.shape_cast %181 : vector<1x32x64xf32> to vector<32x64xf32>
    %cst_59 = arith.constant dense<0.000000e+00> : vector<16x64xf32>
    %183 = tpu.matmul %180, %182, %cst_59 {dimension_numbers = #tpu.dot_dimension_numbers<[1], [0], [0], [1], [0, 0, 1, 1], [], []>} : vector<16x32xf32>, vector<32x64xf32>, vector<16x64xf32> -> vector<16x64xf32>
    %184 = vector.broadcast %112 : vector<1x64xf32> to vector<16x64xf32>
    %185 = arith.addf %183, %184 : vector<16x64xf32>
    %cst_60 = arith.constant 0.000000e+00 : f32
    %186 = vector.broadcast %cst_60 : f32 to vector<16x64xf32>
    %187 = arith.maximumf %185, %186 : vector<16x64xf32>
    %c1_61 = arith.constant 1 : index
    %c0_62 = arith.constant 0 : index
    %c0_63 = arith.constant 0 : index
    %188 = vector.load %arg5[%c1_61, %c0_62, %c0_63] : memref<2x64x32xf32, #tpu.memory_space<vmem>>, vector<1x64x32xf32>
    %189 = vector.shape_cast %188 : vector<1x64x32xf32> to vector<64x32xf32>
    %cst_64 = arith.constant dense<0.000000e+00> : vector<16x32xf32>
    %190 = tpu.matmul %187, %189, %cst_64 {dimension_numbers = #tpu.dot_dimension_numbers<[1], [0], [0], [1], [0, 0, 1, 1], [], []>} : vector<16x64xf32>, vector<64x32xf32>, vector<16x32xf32> -> vector<16x32xf32>
    %191 = vector.broadcast %114 : vector<1x32xf32> to vector<16x32xf32>
    %192 = arith.addf %190, %191 : vector<16x32xf32>
    %193 = arith.addf %180, %192 : vector<16x32xf32>
    %cst_65 = arith.constant dense<0.000000e+00> : vector<16xf32>
    %194 = vector.multi_reduction <add>, %193, %cst_65 [1] : vector<16x32xf32> to vector<16xf32>
    %195 = vector.shape_cast %194 : vector<16xf32> to vector<16x1xf32>
    %cst_66 = arith.constant 3.200000e+01 : f32
    %196 = vector.broadcast %cst_66 : f32 to vector<16x1xf32>
    %197 = arith.divf %195, %196 : vector<16x1xf32>
    %198 = vector.broadcast %197 : vector<16x1xf32> to vector<16x32xf32>
    %199 = arith.subf %193, %198 : vector<16x32xf32>
    %200 = arith.mulf %199, %199 : vector<16x32xf32>
    %cst_67 = arith.constant dense<0.000000e+00> : vector<16xf32>
    %201 = vector.multi_reduction <add>, %200, %cst_67 [1] : vector<16x32xf32> to vector<16xf32>
    %202 = vector.shape_cast %201 : vector<16xf32> to vector<16x1xf32>
    %cst_68 = arith.constant 3.200000e+01 : f32
    %203 = vector.broadcast %cst_68 : f32 to vector<16x1xf32>
    %204 = arith.divf %202, %203 : vector<16x1xf32>
    %205 = vector.broadcast %197 : vector<16x1xf32> to vector<16x32xf32>
    %206 = arith.subf %193, %205 : vector<16x32xf32>
    %cst_69 = arith.constant 9.99999974E-6 : f32
    %207 = vector.broadcast %cst_69 : f32 to vector<16x1xf32>
    %208 = arith.addf %204, %207 : vector<16x1xf32>
    %209 = math.rsqrt %208 : vector<16x1xf32>
    %210 = vector.broadcast %209 : vector<16x1xf32> to vector<16x32xf32>
    %211 = arith.mulf %206, %210 : vector<16x32xf32>
    %212 = vector.broadcast %117 : vector<1x32xf32> to vector<16x32xf32>
    %213 = arith.mulf %211, %212 : vector<16x32xf32>
    %214 = vector.broadcast %118 : vector<1x32xf32> to vector<16x32xf32>
    %215 = arith.addf %213, %214 : vector<16x32xf32>
    %c0_70 = arith.constant 0 : index
    %c0_71 = arith.constant 0 : index
    %216 = vector.load %arg7[%c0_70, %c0_71] : memref<16x32xf32, #tpu.memory_space<vmem>>, vector<16x32xf32>
    tpu.vector_store %arg7[%c0_70, %c0_71], %215 {strides = array<i32>} : memref<16x32xf32, #tpu.memory_space<vmem>>, vector<16x32xf32>,
    return
  }
}

</mosaic_0001>

<bundles_post_ra>
// kernel: tpu_custom_call.1
= control target key start
LH: loop header
LB: loop body
LE: loop exit
PB: predicated region body
PF: predicated region fallthrough
CT: control target
= control target key end

     0   :  { %12 = vsyncpa [#allocation3], 0  ;;  %s7813_s0 = inlined_call_operand.hbm [shape: f32[16,32], index: 0, kind: input, shape index: {}]   ;;  %s7814_s1 = inlined_call_operand.hbm [shape: f32[8,1,8], index: 1, kind: input, shape index: {}]   ;;  %s7815_s2 = inlined_call_operand.vmem [shape: f32[2,32,96], index: 2, kind: input, shape index: {}]   ;;  %s7816_s3 = inlined_call_operand.vmem [shape: f32[2,32,32], index: 3, kind: input, shape index: {}]   ;;  %s7817_s4 = inlined_call_operand.vmem [shape: f32[2,32,64], index: 4, kind: input, shape index: {}]   ;;  %s7818_s5 = inlined_call_operand.vmem [shape: f32[2,64,32], index: 5, kind: input, shape index: {}]   ;;  %s7819_s6 = inlined_call_operand.vmem [shape: f32[2,8,96], index: 6, kind: input, shape index: {}]   ;;  %s7820_s7 = inlined_call_operand.hbm [shape: f32[16,32], index: 7, kind: output, shape index: {}]  }
   0x1   :  { %13 = vsyncpa [#allocation6], 0 }
   0x2   :  { %14 = vsyncpa [#allocation4], 0  ;;  %s6732_s24 = smov [#allocation2]   ;;  %s6660_s28 = scalar_lea.hbm %s7813_s0, 256 }
   0x3   :  { %s20_s25 = sshll.u32 %s6732_s24, 4  ;;  %p6661_p0 = scmp.ne.s32.totalorder %s7813_s0, %s6660_s28  ;;  %s21_s25 = int_to_ptr.vmem [resolvable:$true] %s20_s25 }
   0x4   :  { %p6664_p1 = scmp.lt.u32.totalorder %s6660_s28, %s7813_s0 }
   0x6   :  { %p6666_p2 = pnand %p6664_p1, %p6661_p0 }
   0x8   :  { %6669 = shalt.err (!%p6666_p2)
}
   0x9   :  { %s6670_s10 = scalar_lea.vmem %s21_s25, 256  ;;  %p6675_p4 = scmp.lt.s32.totalorder %s21_s25, %s21_s25 }
   0xa   :  { %p6671_p3 = scmp.ne.s32.totalorder %s21_s25, %s6670_s10  ;;  %p6676_p5 = scmp.lt.s32.totalorder %s6670_s10, %s6670_s10 }
   0xc   :  { %p6677_p6 = por %p6676_p5, %p6675_p4 }
   0xe   :  { %p6678_p7 = pnand %p6677_p6, %p6671_p3 }
  0x10   :  { %6681 = shalt.err (!%p6678_p7)
}
  0x11   :  { %s6733_s11 = smov 128   ;;  %s6734_s12 = smov 8  }
  0x12   :  { %26 = dma.hbm_to_vmem [thread:$0]  %s7813_s0, 256, %s21_s25, [#allocation3], %s6733_s11, %s6733_s11, %s6734_s12  }
  0x13   :  { %s6735_s15 = smov [#allocation5]   ;;  %s6682_s19 = scalar_lea.hbm %s7814_s1, 128 }
  0x14   :  { %s32_s16 = sshll.u32 %s6735_s15, 4  ;;  %p6683_p8 = scmp.ne.s32.totalorder %s7814_s1, %s6682_s19  ;;  %s33_s16 = int_to_ptr.vmem [resolvable:$true] %s32_s16 }
  0x15   :  { %p6686_p9 = scmp.lt.u32.totalorder %s6682_s19, %s7814_s1 }
  0x17   :  { %p6688_p10 = pnand %p6686_p9, %p6683_p8 }
  0x19   :  { %6691 = shalt.err (!%p6688_p10)
}
  0x1a   :  { %s6692_s24 = scalar_lea.vmem %s33_s16, 128  ;;  %p6697_p12 = scmp.lt.s32.totalorder %s33_s16, %s33_s16 }
  0x1b   :  { %p6693_p11 = scmp.ne.s32.totalorder %s33_s16, %s6692_s24  ;;  %p6698_p13 = scmp.lt.s32.totalorder %s6692_s24, %s6692_s24 }
  0x1d   :  { %p6699_p0 = por %p6698_p13, %p6697_p12 }
  0x1f   :  { %p6700_p1 = pnand %p6699_p0, %p6693_p11 }
  0x21   :  { %6703 = shalt.err (!%p6700_p1)
}
  0x22   :  { %s6736_s0 = smov 16   ;;  %s6737_s25 = smov 1  }
  0x23   :  { %38 = dma.hbm_to_vmem [thread:$0]  %s7814_s1, 128, %s33_s16, [#allocation6], %s6736_s0, %s6736_s0, %s6737_s25  }
  0x24   :  { %6726 = dma.done.wait [#allocation3], 256  }
  0x25   :  { %6727 = vsyncadd [#allocation3], 4294967040 }
  0x26   :  { %6728 = dma.done.wait [#allocation6], 128  }
  0x27   :  { %6729 = vsyncadd [#allocation6], 4294967168  ;;  %vm74_vm0 = vcmask 261120   ;;  %v66_v0 = vld [vmem:[%s7815_s2] sm:$0xff]  ;;  %v67_v1 = vld [vmem:[%s7815_s2 + $0x8] sm:$0xff]  ;;  %v70_v8 = vlaneseq  ;;  %s6738_s16 = smov 104  }
  0x28   :  { %v68_v2 = vld [vmem:[%s7815_s2 + $0x10] sm:$0xff]  ;;  %v6471_v3 = vpack.c.bf16 %v67_v1, %v66_v0  ;;  %v69_v4 = vld [vmem:[%s7815_s2 + $0x18] sm:$0xff]  ;;  %v55_v5 = vld [vmem:[#allocation2] sm:$0xff]  ;;  %s6739_s17 = smov 120   ;;  %s6740_s18 = smov 112   ;;  %v6742_v23 = vmov 0.0  }
  0x29   :  { %v6475_v6 = vpack.c.bf16 %v69_v4, %v68_v2  ;;  %6215 = vmatprep.mubr.msk.f32.mxu1 %vm74_vm0, %v55_v5  ;;  %v56_v7 = vld [vmem:[#allocation2 + $0x8] sm:$0xff]  ;;  %v6832_v9 = vshrl.u32 %v70_v8, 7  ;;  %v65_v11 = vld [vmem:[%s7819_s6] sm:$0xff]  ;;  %s6741_s19 = smov 96   ;;  %s6743_s20 = smov 64   ;;  %6228 = vmatprep.subr.mxu0 %v6742_v23  ;;  %vm6744_vm1 = vmmov 0  }
  0x2a   :  { %6472 = vmatprep.subr.bf16.mxu1 %v6471_v3  ;;  %6230 = vmatprep.mubr.msk.f32.mxu0 %vm6744_vm1, %v6742_v23  ;;  %v6745_v24 = vmov 1983009808   ;;  %v6746_v27 = vmov 1934713408   ;;  %vm1088_vm2 = vcmask 64512   ;;  %s6747_s21 = smov 24  }
  0x2b   :  { %6474 = vmatpush3.bf16.msra.mxu1 %v6471_v3  ;;  %v72_v10 = vsub.s32 0, %v6832_v9  ;;  %v179_v25 = vunpack.c.l.s4 %v6745_v24  ;;  %v211_v28 = vunpack.c.l.s4 %v6746_v27  ;;  %vm2667_vm3 = vcmask 130048  }
  0x2c   :  { %6476 = vmatprep.subr.bf16.mxu1 %v6475_v6  ;;  %vm2670_vm4 = vcmask 195584   ;;  %vm2906_vm5 = vcmask 523264  }
  0x2d   :  { %v73_v12 = vrot.slane %v65_v11, %v72_v10  ;;  %v180_v26 = vunpack.c.0.s8 %v179_v25  ;;  %v212_v33 = vunpack.c.0.s8 %v211_v28 }
  0x2f   :  { %6478 = vmatpush3.bf16.msra.mxu1 %v6475_v6  ;;  %v6888_v31 = vsub.s32 %v180_v26, %v6832_v9  ;;  %v6898_v38 = vsub.s32 %v212_v33, %v6832_v9 }
  0x30   :  { %6218 = vmatprep.subr.mxu1 %v6742_v23 }
  0x32   :  { %6216 = vmatmul.mubr.msk.f32.vlgmr.msra.gmra.mrb[0].mxu1 %vm74_vm0, %v56_v7 }
  0x33   :  { %6220 = vmatprep.mubr.msk.f32.mxu1 %vm6744_vm1, %v6742_v23 }
 0x105   :  { %v6217_v13 = vpop.f32.mrb[0].mxu1 }
 0x106   :  { %v147_v14 = vpop.f32.mrb[1].mxu1  ;;  %v6842_v16 = vadd.f32 %v6217_v13, %v73_v12 }
 0x107   :  { %v148_v15 = vadd.f32 %v147_v14, %v73_v12 }
 0x109   :  { %170 = vrot.lane.b32.xlu1 %v148_v15, %s6738_s16  ;;  %158 = vrot.lane.b32.xlu0 %v148_v15, %s6739_s17 }
 0x10d   :  { %160 = vrot.lane.b32.xlu1 %v6842_v16, %s6739_s17  ;;  %164 = vrot.lane.b32.xlu0 %v148_v15, %s6740_s18 }
 0x111   :  { %172 = vrot.lane.b32.xlu1 %v6842_v16, %s6738_s16  ;;  %166 = vrot.lane.b32.xlu0 %v6842_v16, %s6740_s18 }
 0x115   :  { %448 = vrot.lane.b32.xlu0 %v148_v15, %s6741_s19 }
 0x17b   :  { %v6852_v17 = vpop.permute.xlu1 %170  ;;  %v6854_v18 = vpop.permute.xlu0 %158 }
 0x17c   :  { %452 = vrot.lane.b32.xlu1 %v6854_v18, %s6741_s19  ;;  %v192_v32 = vcombine.low %v6854_v18, %v6852_v17  ;;  %v193_v34 = vcombine.high %v6854_v18, %v6852_v17 }
 0x17e   :  { %v200_v37 = vrot.slane %v192_v32, %v6888_v31  ;;  %v207_v39 = vrot.slane %v193_v34, %v6888_v31 }
 0x17f   :  { %v6858_v19 = vpop.permute.xlu0 %164  ;;  %v6864_v20 = vpop.permute.xlu1 %160 }
 0x180   :  { %460 = vrot.lane.b32.xlu1 %v6852_v17, %s6741_s19  ;;  %456 = vrot.lane.b32.xlu0 %v6858_v19, %s6741_s19  ;;  %v176_v29 = vcombine.low %v148_v15, %v6858_v19  ;;  %v177_v30 = vcombine.high %v148_v15, %v6858_v19 }
 0x182   :  { %v184_v35 = vrot.slane %v176_v29, %v6888_v31  ;;  %v191_v36 = vrot.slane %v177_v30, %v6888_v31 }
 0x183   :  { %v6870_v21 = vpop.permute.xlu1 %172  ;;  %v6872_v22 = vpop.permute.xlu0 %166 }
 0x184   :  { %454 = vrot.lane.b32.xlu1 %v6864_v20, %s6741_s19  ;;  %450 = vrot.lane.b32.xlu0 %v6842_v16, %s6741_s19  ;;  %v260_v40 = vcombine.low %v6864_v20, %v6870_v21  ;;  %v244_v41 = vcombine.low %v6842_v16, %v6872_v22  ;;  %v208_v42 = vcombine.low %v184_v35, %v200_v37 }
 0x185   :  { %v209_v43 = vcombine.high %v184_v35, %v200_v37  ;;  %v261_v44 = vcombine.high %v6864_v20, %v6870_v21  ;;  %v245_v45 = vcombine.high %v6842_v16, %v6872_v22  ;;  %v224_v46 = vcombine.low %v191_v36, %v207_v39 }
 0x186   :  { %v225_v47 = vcombine.high %v191_v36, %v207_v39  ;;  %v268_v48 = vrot.slane %v260_v40, %v6888_v31  ;;  %v252_v49 = vrot.slane %v244_v41, %v6888_v31  ;;  %v216_v50 = vrot.slane %v208_v42, %v6898_v38 }
 0x187   :  { %v223_v51 = vrot.slane %v209_v43, %v6898_v38  ;;  %v275_v52 = vrot.slane %v261_v44, %v6888_v31  ;;  %v259_v53 = vrot.slane %v245_v45, %v6888_v31  ;;  %v232_v54 = vrot.slane %v224_v46, %v6898_v38  ;;  %v449_v0 = vpop.permute.xlu0 %448 }
 0x188   :  { %462 = vrot.lane.b32.xlu1 %v6870_v21, %s6741_s19  ;;  %458 = vrot.lane.b32.xlu0 %v6872_v22, %s6741_s19  ;;  %v239_v55 = vrot.slane %v225_v47, %v6898_v38  ;;  %v276_v56 = vcombine.low %v252_v49, %v268_v48  ;;  %v277_v57 = vcombine.high %v252_v49, %v268_v48 }
 0x189   :  { %v312_v58 = vcombine.low %v216_v50, %v223_v51  ;;  %v292_v59 = vcombine.low %v259_v53, %v275_v52  ;;  %v5964_v60 = vcombine.high %v216_v50, %v223_v51  ;;  %v293_v63 = vcombine.high %v259_v53, %v275_v52 }
 0x18a   :  { %v328_v61 = vcombine.low %v232_v54, %v239_v55  ;;  %v5965_v62 = vcombine.high %v232_v54, %v239_v55  ;;  %v284_v2 = vrot.slane %v276_v56, %v6898_v38  ;;  %v291_v3 = vrot.slane %v277_v57, %v6898_v38 }
 0x18b   :  { %v300_v4 = vrot.slane %v292_v59, %v6898_v38  ;;  %v6921_v5 = vrot.slane %v312_v58, %v6888_v31  ;;  %v307_v6 = vrot.slane %v293_v63, %v6898_v38  ;;  %v6925_v11 = vrot.slane %v5964_v60, %v6888_v31 }
 0x18c   :  { %744 = vrot.lane.b32.xlu1 %v148_v15, %s6743_s20  ;;  %v6928_v12 = vrot.slane %v328_v61, %v6888_v31  ;;  %v6931_v13 = vrot.slane %v5965_v62, %v6888_v31  ;;  %v380_v26 = vcombine.low %v284_v2, %v291_v3  ;;  %v5966_v27 = vcombine.high %v284_v2, %v291_v3 }
 0x18d   :  { %v396_v33 = vcombine.low %v300_v4, %v307_v6  ;;  %v5967_v34 = vcombine.high %v300_v4, %v307_v6  ;;  %v344_v36 = vcombine.low %v6921_v5, %v6925_v11  ;;  %v345_v44 = vcombine.high %v6921_v5, %v6925_v11 }
 0x18e   :  { %v360_v37 = vcombine.low %v6928_v12, %v6931_v13  ;;  %v361_v45 = vcombine.high %v6928_v12, %v6931_v13  ;;  %v6946_v46 = vrot.slane %v380_v26, %v6888_v31  ;;  %v6949_v47 = vrot.slane %v5966_v27, %v6888_v31 }
 0x18f   :  { %v6956_v53 = vrot.slane %v344_v36, %v6898_v38  ;;  %v6962_v55 = vrot.slane %v396_v33, %v6888_v31  ;;  %v6965_v56 = vrot.slane %v5967_v34, %v6888_v31 }
 0x190   :  { %v6959_v54 = vrot.slane %v360_v37, %v6898_v38 }
 0x1ee   :  { %v453_v1 = vpop.permute.xlu1 %452 }
 0x1f2   :  { %v461_v7 = vpop.permute.xlu1 %460  ;;  %v457_v8 = vpop.permute.xlu0 %456 }
 0x1f3   :  { %v488_v14 = vcombine.low %v453_v1, %v461_v7  ;;  %v489_v15 = vcombine.high %v453_v1, %v461_v7  ;;  %v472_v24 = vcombine.low %v449_v0, %v457_v8  ;;  %v473_v25 = vcombine.high %v449_v0, %v457_v8 }
 0x1f5   :  { %v496_v28 = vrot.slane %v488_v14, %v6888_v31  ;;  %v503_v29 = vrot.slane %v489_v15, %v6888_v31  ;;  %v480_v30 = vrot.slane %v472_v24, %v6888_v31  ;;  %v487_v32 = vrot.slane %v473_v25, %v6888_v31 }
 0x1f6   :  { %v455_v35 = vpop.permute.xlu1 %454  ;;  %v451_v43 = vpop.permute.xlu0 %450 }
 0x1f7   :  { %v504_v39 = vcombine.low %v480_v30, %v496_v28  ;;  %v505_v40 = vcombine.high %v480_v30, %v496_v28  ;;  %v520_v41 = vcombine.low %v487_v32, %v503_v29  ;;  %v521_v42 = vcombine.high %v487_v32, %v503_v29 }
 0x1f9   :  { %v512_v48 = vrot.slane %v504_v39, %v6898_v38  ;;  %v519_v49 = vrot.slane %v505_v40, %v6898_v38  ;;  %v528_v50 = vrot.slane %v520_v41, %v6898_v38  ;;  %v535_v51 = vrot.slane %v521_v42, %v6898_v38 }
 0x1fa   :  { %v463_v52 = vpop.permute.xlu1 %462  ;;  %v459_v61 = vpop.permute.xlu0 %458  ;;  %v359_v40 = vrot.slane %v345_v44, %v6898_v38  ;;  %v375_v41 = vrot.slane %v361_v45, %v6898_v38 }
 0x1fb   :  { %v608_v57 = vcombine.low %v512_v48, %v519_v49  ;;  %v5968_v58 = vcombine.high %v512_v48, %v519_v49  ;;  %v624_v59 = vcombine.low %v528_v50, %v535_v51  ;;  %v5969_v60 = vcombine.high %v528_v50, %v535_v51 }
 0x1fc   :  { %v556_v62 = vcombine.low %v455_v35, %v463_v52  ;;  %v557_v63 = vcombine.high %v455_v35, %v463_v52  ;;  %v540_v0 = vcombine.low %v451_v43, %v459_v61  ;;  %v541_v1 = vcombine.high %v451_v43, %v459_v61 }
 0x1fd   :  { %v615_v2 = vrot.slane %v608_v57, %v6888_v31  ;;  %v623_v3 = vrot.slane %v5968_v58, %v6888_v31  ;;  %v631_v4 = vrot.slane %v624_v59, %v6888_v31  ;;  %v639_v5 = vrot.slane %v5969_v60, %v6888_v31 }
 0x1fe   :  { %v564_v6 = vrot.slane %v556_v62, %v6888_v31  ;;  %v571_v7 = vrot.slane %v557_v63, %v6888_v31  ;;  %v548_v8 = vrot.slane %v540_v0, %v6888_v31  ;;  %v555_v11 = vrot.slane %v541_v1, %v6888_v31 }
 0x1ff   :  { %v640_v12 = vcombine.low %v615_v2, %v623_v3  ;;  %v656_v13 = vcombine.low %v631_v4, %v639_v5  ;;  %v641_v14 = vcombine.high %v615_v2, %v623_v3  ;;  %v657_v15 = vcombine.high %v631_v4, %v639_v5 }
 0x200   :  { %v572_v24 = vcombine.low %v548_v8, %v564_v6  ;;  %v573_v25 = vcombine.high %v548_v8, %v564_v6  ;;  %v588_v26 = vcombine.low %v555_v11, %v571_v7  ;;  %v589_v27 = vcombine.high %v555_v11, %v571_v7 }
 0x201   :  { %v648_v28 = vrot.slane %v640_v12, %v6898_v38  ;;  %v664_v29 = vrot.slane %v656_v13, %v6898_v38  ;;  %v655_v30 = vrot.slane %v641_v14, %v6898_v38  ;;  %v671_v32 = vrot.slane %v657_v15, %v6898_v38 }
 0x202   :  { %v580_v33 = vrot.slane %v572_v24, %v6898_v38  ;;  %v587_v34 = vrot.slane %v573_v25, %v6898_v38  ;;  %v596_v35 = vrot.slane %v588_v26, %v6898_v38  ;;  %v603_v36 = vrot.slane %v589_v27, %v6898_v38  ;;  %v5976_v26 = vld [vmem:[#allocation5] ss:$0 sm:$0xff] }
 0x203   :  { %v672_v37 = vcombine.low %v648_v28, %v664_v29  ;;  %v674_v39 = vcombine.low %v655_v30, %v671_v32  ;;  %v376_v50 = vcombine.low %v6956_v53, %v6959_v54  ;;  %v378_v45 = vcombine.low %v359_v40, %v375_v41 }
 0x204   :  { %v676_v42 = vcombine.low %v580_v33, %v587_v34  ;;  %v5970_v43 = vcombine.high %v580_v33, %v587_v34  ;;  %v692_v48 = vcombine.low %v596_v35, %v603_v36  ;;  %v5971_v49 = vcombine.high %v596_v35, %v603_v36  ;;  %v5977_v34 = vld [vmem:[#allocation5 + $0x1] ss:$0 sm:$0xff] }
 0x205   :  { %6219 = vmatpush3.xpose.msk.msra.mxu1 %vm1088_vm2, %v672_v37  ;;  %6229 = vmatpush3.xpose.msk.msra.mxu0 %vm1088_vm2, %v674_v39  ;;  %v673_v58 = vcombine.high %v648_v28, %v664_v29  ;;  %v412_v59 = vcombine.low %v6946_v46, %v6949_v47  ;;  %v428_v60 = vcombine.low %v6962_v55, %v6965_v56  ;;  %v5978_v28 = vld [vmem:[#allocation5 + $0x2] ss:$0 sm:$0xff] }
 0x206   :  { %v683_v51 = vrot.slane %v676_v42, %v6888_v31  ;;  %v691_v52 = vrot.slane %v5970_v43, %v6888_v31  ;;  %v699_v57 = vrot.slane %v692_v48, %v6888_v31  ;;  %v707_v44 = vrot.slane %v5971_v49, %v6888_v31  ;;  %6223 = vmatprep.subr.mxu1 %v6742_v23  ;;  %v5980_v48 = vld [vmem:[#allocation5 + $0x4] ss:$0 sm:$0xff] }
 0x207   :  { %6238 = vmatprep.subr.mxu0 %v6742_v23  ;;  %v413_v1 = vcombine.high %v6946_v46, %v6949_v47  ;;  %v377_v2 = vcombine.high %v6956_v53, %v6959_v54  ;;  %v675_v5 = vcombine.high %v655_v30, %v671_v32  ;;  %v420_v6 = vrot.slane %v412_v59, %v6898_v38  ;;  %v5982_v59 = vld [vmem:[#allocation5 + $0x6] ss:$0 sm:$0xff] }
 0x208   :  { %v708_v61 = vcombine.low %v683_v51, %v691_v52  ;;  %v709_v62 = vcombine.high %v683_v51, %v691_v52  ;;  %v724_v63 = vcombine.low %v699_v57, %v707_v44  ;;  %v725_v0 = vcombine.high %v699_v57, %v707_v44  ;;  %6221 = vmatmul.mubr.msk.f32.vlgmr.msra.gmra.mrb[2].mxu1 %vm1088_vm2, %v376_v50 }
 0x209   :  { %6231 = vmatmul.mubr.msk.f32.vlgmr.msra.gmra.mrb[0].mxu0 %vm1088_vm2, %v378_v45  ;;  %6224 = vmatpush3.xpose.msk.msra.mxu1 %vm1088_vm2, %v673_v58  ;;  %v436_v46 = vrot.slane %v428_v60, %v6898_v38  ;;  %v429_v47 = vcombine.high %v6962_v55, %v6965_v56  ;;  %v379_v8 = vcombine.high %v359_v40, %v375_v41  ;;  %v5979_v41 = vld [vmem:[#allocation5 + $0x3] ss:$0 sm:$0xff]  ;;  %v5981_v45 = vld [vmem:[#allocation5 + $0x5] ss:$0 sm:$0xff] }
 0x20a   :  { %6225 = vmatprep.mubr.msk.f32.mxu1 %vm6744_vm1, %v6742_v23  ;;  %6233 = vmatprep.subr.mxu1 %v6742_v23  ;;  %v716_v3 = vrot.slane %v708_v61, %v6898_v38  ;;  %v732_v4 = vrot.slane %v724_v63, %v6898_v38  ;;  %v723_v54 = vrot.slane %v709_v62, %v6898_v38 }
 0x20b   :  { %6240 = vmatprep.mubr.msk.f32.mxu0 %vm6744_vm1, %v6742_v23  ;;  %v739_v7 = vrot.slane %v725_v0, %v6898_v38  ;;  %v444_v11 = vcombine.low %v420_v6, %v436_v46  ;;  %v427_v56 = vrot.slane %v413_v1, %v6898_v38  ;;  %v443_v12 = vrot.slane %v429_v47, %v6898_v38 }
 0x20c   :  { %6226 = vmatmul.mubr.msk.f32.vlgmr.msra.gmra.mrb[4].mxu1 %vm1088_vm2, %v377_v2  ;;  %v740_v53 = vcombine.low %v716_v3, %v732_v4  ;;  %v741_v55 = vcombine.high %v716_v3, %v732_v4  ;;  %v445_v14 = vcombine.high %v420_v6, %v436_v46  ;;  %v5983_v3 = vld [vmem:[#allocation5 + $0x7] ss:$0 sm:$0xff] }
 0x20d   :  { %6234 = vmatpush3.xpose.msk.msra.mxu1 %vm1088_vm2, %v675_v5  ;;  %6235 = vmatprep.mubr.msk.f32.mxu1 %vm6744_vm1, %v6742_v23  ;;  %v742_v13 = vcombine.low %v723_v54, %v739_v7  ;;  %v446_v15 = vcombine.low %v427_v56, %v443_v12  ;;  %v743_v24 = vcombine.high %v723_v54, %v739_v7  ;;  %v745_v54 = vpop.permute.xlu1 %744 }
 0x20e   :  { %6239 = vmatpush3.xpose.msk.msra.mxu0 %vm1088_vm2, %v740_v53  ;;  %6243 = vmatprep.subr.mxu1 %v6742_v23  ;;  %v447_v25 = vcombine.high %v427_v56, %v443_v12 }
 0x20f   :  { %6248 = vmatprep.subr.mxu0 %v6742_v23 }
 0x210   :  { %6236 = vmatmul.mubr.msk.f32.vlgmr.msra.gmra.mrb[6].mxu1 %vm1088_vm2, %v379_v8 }
 0x211   :  { %6241 = vmatmul.mubr.msk.f32.vlgmr.msra.gmra.mrb[2].mxu0 %vm1088_vm2, %v444_v11  ;;  %6244 = vmatpush3.xpose.msk.msra.mxu1 %vm1088_vm2, %v741_v55 }
 0x212   :  { %6249 = vmatpush3.xpose.msk.msra.mxu0 %vm1088_vm2, %v742_v13  ;;  %6245 = vmatprep.mubr.msk.f32.mxu1 %vm6744_vm1, %v6742_v23 }
 0x213   :  { %6250 = vmatprep.mubr.msk.f32.mxu0 %vm6744_vm1, %v6742_v23  ;;  %6253 = vmatprep.subr.mxu1 %v6742_v23 }
 0x214   :  { %6246 = vmatmul.mubr.msk.f32.vlgmr.msra.gmra.mrb[8].mxu1 %vm1088_vm2, %v445_v14  ;;  %6258 = vmatprep.subr.mxu0 %v6742_v23 }
 0x215   :  { %6251 = vmatmul.mubr.msk.f32.vlgmr.msra.gmra.mrb[4].mxu0 %vm1088_vm2, %v446_v15  ;;  %6254 = vmatpush3.xpose.msk.msra.mxu1 %vm1088_vm2, %v743_v24 }
 0x216   :  { %6255 = vmatprep.mubr.msk.f32.mxu1 %vm6744_vm1, %v6742_v23  ;;  %6263 = vmatprep.subr.mxu1 %v6742_v23 }
 0x217   :  { %6260 = vmatprep.mubr.msk.f32.mxu0 %vm6744_vm1, %v6742_v23 }
 0x218   :  { %6256 = vmatmul.mubr.msk.f32.vlgmr.msra.gmra.mrb[10].mxu1 %vm1088_vm2, %v447_v25 }
 0x219   :  { %6265 = vmatprep.mubr.msk.f32.mxu1 %vm6744_vm1, %v6742_v23 }
 0x2db   :  { %v1161_v27 = vpop.f32.mrb[2].mxu1 }
 0x2dc   :  { %v1162_v29 = vadd.f32 %v5976_v26, %v1161_v27  ;;  %v1313_v30 = vpop.f32.mrb[0].mxu0  ;;  %v6222_v32 = vpop.f32.mrb[3].mxu1 }
 0x2dd   :  { %v6232_v33 = vpop.f32.mrb[1].mxu0  ;;  %v1314_v35 = vadd.f32 %v5978_v28, %v1313_v30 }
 0x2de   :  { %v1697_v36 = vsel %vm1088_vm2, %v1162_v29, -inf }
 0x2df   :  { %1698 = vmax.xlane.f32.xlu0 %v1697_v36  ;;  %v1237_v37 = vpop.f32.mrb[4].mxu1  ;;  %v1703_v42 = vsel %vm1088_vm2, %v1314_v35, -inf }
 0x2e0   :  { %v1238_v39 = vadd.f32 %v5977_v34, %v1237_v37  ;;  %v6227_v40 = vpop.f32.mrb[5].mxu1 }
 0x2e2   :  { %v1700_v43 = vsel %vm1088_vm2, %v1238_v39, -inf }
 0x2e3   :  { %1704 = vmax.xlane.f32.xlu0 %v1703_v42  ;;  %1701 = vmax.xlane.f32.xlu1 %v1700_v43  ;;  %v1389_v49 = vpop.f32.mrb[6].mxu1 }
 0x2e4   :  { %v1390_v50 = vadd.f32 %v5979_v41, %v1389_v49  ;;  %v1465_v51 = vpop.f32.mrb[2].mxu0  ;;  %v6237_v52 = vpop.f32.mrb[7].mxu1 }
 0x2e5   :  { %v1466_v57 = vadd.f32 %v5980_v48, %v1465_v51  ;;  %v6242_v44 = vpop.f32.mrb[3].mxu0 }
 0x2e6   :  { %v1706_v58 = vsel %vm1088_vm2, %v1390_v50, -inf }
 0x2e7   :  { %1707 = vmax.xlane.f32.xlu0 %v1706_v58  ;;  %v1541_v60 = vpop.f32.mrb[8].mxu1  ;;  %v1709_v61 = vsel %vm1088_vm2, %v1466_v57, -inf }
 0x2e8   :  { %v1542_v62 = vadd.f32 %v5981_v45, %v1541_v60  ;;  %1710 = vmax.xlane.f32.xlu1 %v1709_v61  ;;  %v1617_v63 = vpop.f32.mrb[4].mxu0  ;;  %v6247_v0 = vpop.f32.mrb[9].mxu1 }
 0x2e9   :  { %v1618_v1 = vadd.f32 %v5982_v59, %v1617_v63  ;;  %v6252_v2 = vpop.f32.mrb[5].mxu0 }
 0x2ea   :  { %v1712_v4 = vsel %vm1088_vm2, %v1542_v62, -inf }
 0x2eb   :  { %1713 = vmax.xlane.f32.xlu0 %v1712_v4  ;;  %v1693_v5 = vpop.f32.mrb[10].mxu1  ;;  %v1715_v6 = vsel %vm1088_vm2, %v1618_v1, -inf }
 0x2ec   :  { %v1694_v46 = vadd.f32 %v5983_v3, %v1693_v5  ;;  %1716 = vmax.xlane.f32.xlu1 %v1715_v6  ;;  %v6257_v47 = vpop.f32.mrb[11].mxu1 }
 0x2ee   :  { %v1718_v53 = vsel %vm1088_vm2, %v1694_v46, -inf }
 0x2ef   :  { %1719 = vmax.xlane.f32.xlu0 %v1718_v53 }
 0x2fd   :  { %752 = vrot.lane.b32.xlu1 %v6858_v19, %s6743_s20 }
 0x301   :  { %756 = vrot.lane.b32.xlu1 %v6852_v17, %s6743_s20 }
 0x305   :  { %746 = vrot.lane.b32.xlu1 %v6842_v16, %s6743_s20  ;;  %748 = vrot.lane.b32.xlu0 %v6854_v18, %s6743_s20 }
 0x36c   :  { %v1699_v7 = vpop.xlane.xlu0 %1698 }
 0x36d   :  { %v1721_v8 = vsub.f32 %v1162_v29, %v1699_v7 }
 0x36f   :  { %v1729_v11 = vmul.f32 1.442695, %v1721_v8 }
 0x370   :  { %v1702_v55 = vpop.xlane.xlu1 %1701  ;;  %v1705_v56 = vpop.xlane.xlu0 %1704 }
 0x371   :  { %6568 = vpow2.f32 %v1729_v11  ;;  %v1722_v12 = vsub.f32 %v1238_v39, %v1702_v55  ;;  %v1723_v13 = vsub.f32 %v1314_v35, %v1705_v56 }
 0x373   :  { %v1731_v14 = vmul.f32 1.442695, %v1722_v12  ;;  %v1733_v19 = vmul.f32 1.442695, %v1723_v13 }
 0x374   :  { %v1708_v15 = vpop.xlane.xlu0 %1707 }
 0x375   :  { %6570 = vpow2.f32 %v1731_v14  ;;  %v1711_v17 = vpop.xlane.xlu1 %1710  ;;  %v1724_v24 = vsub.f32 %v1390_v50, %v1708_v15 }
 0x376   :  { %6572 = vpow2.f32 %v1733_v19  ;;  %v1725_v16 = vsub.f32 %v1466_v57, %v1711_v17 }
 0x377   :  { %v1735_v26 = vmul.f32 1.442695, %v1724_v24 }
 0x378   :  { %v1737_v25 = vmul.f32 1.442695, %v1725_v16  ;;  %v1714_v18 = vpop.xlane.xlu0 %1713 }
 0x379   :  { %v1717_v27 = vpop.xlane.xlu1 %1716  ;;  %v1726_v28 = vsub.f32 %v1542_v62, %v1714_v18 }
 0x37a   :  { %6574 = vpow2.f32 %v1737_v25  ;;  %v1727_v29 = vsub.f32 %v1618_v1, %v1717_v27 }
 0x37b   :  { %v7065_v30 = vpop.eup %6568  ;;  %v1739_v32 = vmul.f32 1.442695, %v1726_v28  ;;  %6576 = vpow2.f32 %v1735_v26 }
 0x37c   :  { %v1741_v33 = vmul.f32 1.442695, %v1727_v29  ;;  %v1720_v34 = vpop.xlane.xlu0 %1719  ;;  %v1745_v35 = vsel %vm1088_vm2, %v7065_v30, 0.0 }
 0x37d   :  { %6578 = vpow2.f32 %v1739_v32  ;;  %v753_v36 = vpop.permute.xlu1 %752  ;;  %v1728_v37 = vsub.f32 %v1694_v46, %v1720_v34  ;;  %1746 = vadd.xlane.f32.xlu1 %v1745_v35 }
 0x37e   :  { %v768_v40 = vcombine.low %v745_v54, %v753_v36  ;;  %6580 = vpow2.f32 %v1741_v33  ;;  %v769_v42 = vcombine.high %v745_v54, %v753_v36 }
 0x37f   :  { %v7069_v39 = vpop.eup %6570  ;;  %v1743_v43 = vmul.f32 1.442695, %v1728_v37 }
 0x380   :  { %v7071_v41 = vpop.eup %6572  ;;  %v749_v48 = vpop.permute.xlu0 %748  ;;  %v1748_v49 = vsel %vm1088_vm2, %v7069_v39, 0.0  ;;  %v776_v44 = vrot.slane %v768_v40, %v6888_v31  ;;  %v783_v58 = vrot.slane %v769_v42, %v6888_v31 }
 0x381   :  { %v757_v50 = vpop.permute.xlu1 %756  ;;  %1749 = vadd.xlane.f32.xlu0 %v1748_v49  ;;  %v1751_v51 = vsel %vm1088_vm2, %v7071_v41, 0.0  ;;  %6582 = vpow2.f32 %v1743_v43 }
 0x382   :  { %v784_v52 = vcombine.low %v749_v48, %v757_v50  ;;  %v785_v57 = vcombine.high %v749_v48, %v757_v50  ;;  %1752 = vadd.xlane.f32.xlu1 %v1751_v51 }
 0x384   :  { %v7078_v45 = vpop.eup %6574  ;;  %v792_v59 = vrot.slane %v784_v52, %v6888_v31  ;;  %v799_v60 = vrot.slane %v785_v57, %v6888_v31 }
 0x385   :  { %v1757_v61 = vsel %vm1088_vm2, %v7078_v45, 0.0  ;;  %v7085_v62 = vpop.eup %6576  ;;  %v747_v36 = vpop.permute.xlu1 %746 }
 0x386   :  { %v800_v63 = vcombine.low %v776_v44, %v792_v59  ;;  %v801_v0 = vcombine.high %v776_v44, %v792_v59  ;;  %v816_v1 = vcombine.low %v783_v58, %v799_v60  ;;  %v817_v2 = vcombine.high %v783_v58, %v799_v60  ;;  %1758 = vadd.xlane.f32.xlu0 %v1757_v61 }
 0x387   :  { %v7087_v3 = vpop.eup %6578  ;;  %v1754_v47 = vsel %vm1088_vm2, %v7085_v62, 0.0 }
 0x388   :  { %v808_v4 = vrot.slane %v800_v63, %v6898_v38  ;;  %v815_v5 = vrot.slane %v801_v0, %v6898_v38  ;;  %v824_v6 = vrot.slane %v816_v1, %v6898_v38  ;;  %v831_v46 = vrot.slane %v817_v2, %v6898_v38  ;;  %v7097_v54 = vpop.eup %6580 }
 0x389   :  { %v1760_v53 = vsel %vm1088_vm2, %v7087_v3, 0.0  ;;  %v1763_v19 = vsel %vm1088_vm2, %v7097_v54, 0.0 }
 0x38a   :  { %v904_v7 = vcombine.low %v808_v4, %v815_v5  ;;  %v5972_v8 = vcombine.high %v808_v4, %v815_v5  ;;  %v920_v11 = vcombine.low %v824_v6, %v831_v46  ;;  %v5973_v55 = vcombine.high %v824_v6, %v831_v46  ;;  %1755 = vadd.xlane.f32.xlu0 %v1754_v47 }
 0x38b   :  { %1761 = vadd.xlane.f32.xlu1 %v1760_v53  ;;  %v7105_v15 = vpop.eup %6582 }
 0x38c   :  { %v911_v56 = vrot.slane %v904_v7, %v6888_v31  ;;  %v919_v12 = vrot.slane %v5972_v8, %v6888_v31  ;;  %v927_v13 = vrot.slane %v920_v11, %v6888_v31  ;;  %v935_v14 = vrot.slane %v5973_v55, %v6888_v31 }
 0x38d   :  { %v1766_v29 = vsel %vm1088_vm2, %v7105_v15, 0.0 }
 0x38e   :  { %1764 = vadd.xlane.f32.xlu0 %v1763_v19  ;;  %v936_v17 = vcombine.low %v911_v56, %v919_v12  ;;  %v952_v24 = vcombine.low %v927_v13, %v935_v14  ;;  %v937_v16 = vcombine.high %v911_v56, %v919_v12  ;;  %v953_v25 = vcombine.high %v927_v13, %v935_v14 }
 0x390   :  { %v944_v26 = vrot.slane %v936_v17, %v6898_v38  ;;  %v960_v18 = vrot.slane %v952_v24, %v6898_v38  ;;  %v951_v27 = vrot.slane %v937_v16, %v6898_v38  ;;  %v967_v28 = vrot.slane %v953_v25, %v6898_v38 }
 0x392   :  { %1767 = vadd.xlane.f32.xlu0 %v1766_v29  ;;  %v968_v32 = vcombine.low %v944_v26, %v960_v18  ;;  %v969_v33 = vcombine.high %v944_v26, %v960_v18  ;;  %v970_v34 = vcombine.low %v951_v27, %v967_v28  ;;  %v971_v35 = vcombine.high %v951_v27, %v967_v28 }
 0x394   :  { %6259 = vmatpush3.msra.mxu0 %v968_v32  ;;  %6264 = vmatpush3.msra.mxu1 %v969_v33 }
 0x395   :  { %6268 = vmatprep.subr.mxu0 %v6742_v23  ;;  %6273 = vmatprep.subr.mxu1 %v6742_v23 }
 0x39c   :  { %754 = vrot.lane.b32.xlu1 %v6872_v22, %s6743_s20 }
 0x3a0   :  { %758 = vrot.lane.b32.xlu1 %v6870_v21, %s6743_s20 }
 0x3a8   :  { %750 = vrot.lane.b32.xlu0 %v6864_v20, %s6743_s20 }
 0x40a   :  { %v1747_v37 = vpop.xlane.xlu1 %1746 }
 0x40b   :  { %6584 = vrcp.f32 %v1747_v37 }
 0x40e   :  { %v1750_v40 = vpop.xlane.xlu0 %1749 }
 0x40f   :  { %v1753_v42 = vpop.xlane.xlu1 %1752  ;;  %6586 = vrcp.f32 %v1750_v40 }
 0x410   :  { %6588 = vrcp.f32 %v1753_v42 }
 0x413   :  { %v1759_v43 = vpop.xlane.xlu0 %1758 }
 0x415   :  { %v6585_v48 = vpop.eup %6584 }
 0x416   :  { %v1777_v49 = vmul.f32 %v6585_v48, %v7065_v30 }
 0x417   :  { %v1756_v50 = vpop.xlane.xlu0 %1755 }
 0x418   :  { %v1762_v51 = vpop.xlane.xlu1 %1761  ;;  %6590 = vrcp.f32 %v1756_v50  ;;  %6261 = vmatmul.mubr.msk.f32.vlgmr.msra.gmra.mrb[6].mxu0 %vm1088_vm2, %v1777_v49 }
 0x419   :  { %v6587_v21 = vpop.eup %6586  ;;  %6269 = vmatpush3.msra.mxu0 %v970_v34  ;;  %6270 = vmatprep.mubr.msk.f32.mxu0 %vm6744_vm1, %v6742_v23  ;;  %6592 = vrcp.f32 %v1759_v43 }
 0x41a   :  { %v6589_v20 = vpop.eup %6588  ;;  %v1778_v22 = vmul.f32 %v6587_v21, %v7069_v39  ;;  %6278 = vmatprep.subr.mxu0 %v6742_v23  ;;  %6594 = vrcp.f32 %v1762_v51 }
 0x41b   :  { %v1779_v52 = vmul.f32 %v6589_v20, %v7071_v41  ;;  %v1765_v57 = vpop.xlane.xlu0 %1764 }
 0x41c   :  { %6266 = vmatmul.mubr.msk.f32.vlgmr.msra.gmra.mrb[12].mxu1 %vm1088_vm2, %v1778_v22  ;;  %v755_v30 = vpop.permute.xlu1 %754  ;;  %6596 = vrcp.f32 %v1765_v57 }
 0x41d   :  { %6271 = vmatmul.mubr.msk.f32.vlgmr.msra.gmra.mrb[8].mxu0 %vm1088_vm2, %v1779_v52  ;;  %6274 = vmatpush3.msra.mxu1 %v971_v35  ;;  %v836_v58 = vcombine.low %v747_v36, %v755_v30  ;;  %v837_v59 = vcombine.high %v747_v36, %v755_v30 }
 0x41e   :  { %6275 = vmatprep.mubr.msk.f32.mxu1 %vm6744_vm1, %v6742_v23  ;;  %6283 = vmatprep.subr.mxu1 %v6742_v23 }
 0x41f   :  { %v1768_v44 = vpop.xlane.xlu0 %1767  ;;  %6280 = vmatprep.mubr.msk.f32.mxu0 %vm6744_vm1, %v6742_v23  ;;  %v844_v1 = vrot.slane %v836_v58, %v6888_v31  ;;  %v851_v2 = vrot.slane %v837_v59, %v6888_v31 }
 0x420   :  { %v759_v60 = vpop.permute.xlu1 %758  ;;  %6598 = vrcp.f32 %v1768_v44 }
 0x422   :  { %v6591_v39 = vpop.eup %6590 }
 0x423   :  { %v1780_v41 = vmul.f32 %v6591_v39, %v7085_v62  ;;  %v751_v61 = vpop.permute.xlu0 %750  ;;  %v6593_v16 = vpop.eup %6592 }
 0x424   :  { %v852_v63 = vcombine.low %v751_v61, %v759_v60  ;;  %v853_v0 = vcombine.high %v751_v61, %v759_v60  ;;  %v6595_v28 = vpop.eup %6594  ;;  %v1781_v42 = vmul.f32 %v6593_v16, %v7078_v45 }
 0x425   :  { %6276 = vmatmul.mubr.msk.f32.vlgmr.msra.gmra.mrb[14].mxu1 %vm1088_vm2, %v1780_v41  ;;  %v1782_v43 = vmul.f32 %v6595_v28, %v7087_v3 }
 0x426   :  { %v860_v4 = vrot.slane %v852_v63, %v6888_v31  ;;  %v867_v5 = vrot.slane %v853_v0, %v6888_v31  ;;  %6285 = vmatprep.mubr.msk.f32.mxu1 %vm6744_vm1, %v6742_v23  ;;  %v6597_v33 = vpop.eup %6596 }
 0x427   :  { %v1783_v50 = vmul.f32 %v6597_v33, %v7097_v54 }
 0x428   :  { %v868_v62 = vcombine.low %v844_v1, %v860_v4  ;;  %v869_v6 = vcombine.high %v844_v1, %v860_v4  ;;  %v884_v46 = vcombine.low %v851_v2, %v867_v5  ;;  %v885_v47 = vcombine.high %v851_v2, %v867_v5 }
 0x42a   :  { %v876_v53 = vrot.slane %v868_v62, %v6898_v38  ;;  %v883_v7 = vrot.slane %v869_v6, %v6898_v38  ;;  %v892_v8 = vrot.slane %v884_v46, %v6898_v38  ;;  %v899_v11 = vrot.slane %v885_v47, %v6898_v38  ;;  %v6599_v40 = vpop.eup %6598 }
 0x42b   :  { %v1784_v51 = vmul.f32 %v6599_v40, %v7105_v15 }
 0x42c   :  { %v972_v55 = vcombine.low %v876_v53, %v883_v7  ;;  %v5974_v56 = vcombine.high %v876_v53, %v883_v7  ;;  %v988_v12 = vcombine.low %v892_v8, %v899_v11  ;;  %v5975_v13 = vcombine.high %v892_v8, %v899_v11 }
 0x42e   :  { %v979_v14 = vrot.slane %v972_v55, %v6888_v31  ;;  %v987_v19 = vrot.slane %v5974_v56, %v6888_v31  ;;  %v995_v17 = vrot.slane %v988_v12, %v6888_v31  ;;  %v1003_v24 = vrot.slane %v5975_v13, %v6888_v31 }
 0x430   :  { %v1004_v25 = vcombine.low %v979_v14, %v987_v19  ;;  %v1020_v26 = vcombine.low %v995_v17, %v1003_v24  ;;  %v1005_v18 = vcombine.high %v979_v14, %v987_v19  ;;  %v1021_v27 = vcombine.high %v995_v17, %v1003_v24 }
 0x432   :  { %v1012_v29 = vrot.slane %v1004_v25, %v6898_v38  ;;  %v1028_v32 = vrot.slane %v1020_v26, %v6898_v38  ;;  %v1019_v34 = vrot.slane %v1005_v18, %v6898_v38  ;;  %v1035_v35 = vrot.slane %v1021_v27, %v6898_v38 }
 0x434   :  { %v1036_v36 = vcombine.low %v1012_v29, %v1028_v32  ;;  %v1037_v37 = vcombine.high %v1012_v29, %v1028_v32  ;;  %v1038_v48 = vcombine.low %v1019_v34, %v1035_v35  ;;  %v1039_v49 = vcombine.high %v1019_v34, %v1035_v35 }
 0x436   :  { %6279 = vmatpush3.msra.mxu0 %v1036_v36  ;;  %6284 = vmatpush3.msra.mxu1 %v1037_v37 }
 0x437   :  { %6281 = vmatmul.mubr.msk.f32.vlgmr.msra.gmra.mrb[10].mxu0 %vm1088_vm2, %v1781_v42  ;;  %6286 = vmatmul.mubr.msk.f32.vlgmr.msra.gmra.mrb[16].mxu1 %vm1088_vm2, %v1782_v43 }
 0x438   :  { %6288 = vmatprep.subr.mxu0 %v6742_v23  ;;  %6293 = vmatprep.subr.mxu1 %v6742_v23 }
 0x439   :  { %6289 = vmatpush3.msra.mxu0 %v1038_v48  ;;  %6294 = vmatpush3.msra.mxu1 %v1039_v49 }
 0x43a   :  { %6290 = vmatprep.mubr.msk.f32.mxu0 %vm6744_vm1, %v6742_v23  ;;  %6295 = vmatprep.mubr.msk.f32.mxu1 %vm6744_vm1, %v6742_v23 }
 0x43b   :  { %6291 = vmatmul.mubr.msk.f32.vlgmr.msra.gmra.mrb[12].mxu0 %vm1088_vm2, %v1783_v50  ;;  %6296 = vmatmul.mubr.msk.f32.vlgmr.msra.gmra.mrb[18].mxu1 %vm1088_vm2, %v1784_v51 }
 0x4eb   :  { %v1854_v45 = vpop.f32.mrb[6].mxu0 }
 0x4ec   :  { %v6262_v3 = vpop.f32.mrb[7].mxu0 }
 0x4ef   :  { %v1927_v21 = vpop.f32.mrb[12].mxu1 }
 0x4f0   :  { %v2000_v20 = vpop.f32.mrb[8].mxu0  ;;  %v6267_v22 = vpop.f32.mrb[13].mxu1 }
 0x4f1   :  { %v2369_v54 = vcombine.low %v1854_v45, %v2000_v20  ;;  %v2370_v52 = vcombine.high %v1854_v45, %v2000_v20  ;;  %v6272_v15 = vpop.f32.mrb[9].mxu0 }
 0x4f3   :  { %v2377_v58 = vrot.slane %v2369_v54, %v6888_v31  ;;  %v2384_v59 = vrot.slane %v2370_v52, %v6888_v31  ;;  %v2673_v54 = vld [vmem:[%s7816_s3] sm:$0xff]  ;;  %v2674_v52 = vld [vmem:[%s7816_s3 + $0x8] sm:$0xff] }
 0x4f4   :  { %v6479_v15 = vpack.c.bf16 %v2674_v52, %v2673_v54 }
 0x4f6   :  { %6480 = vmatprep.subr.bf16.mxu0 %v6479_v15 }
 0x4f7   :  { %6482 = vmatpush3.bf16.msra.mxu0 %v6479_v15 }
 0x4f8   :  { %v2073_v57 = vpop.f32.mrb[14].mxu1 }
 0x4f9   :  { %v2385_v30 = vcombine.low %v1927_v21, %v2073_v57  ;;  %v2386_v44 = vcombine.high %v1927_v21, %v2073_v57  ;;  %v6277_v39 = vpop.f32.mrb[15].mxu1 }
 0x4fb   :  { %v2393_v41 = vrot.slane %v2385_v30, %v6888_v31  ;;  %v2400_v60 = vrot.slane %v2386_v44, %v6888_v31 }
 0x4fd   :  { %v2401_v61 = vcombine.low %v2377_v58, %v2393_v41  ;;  %v2402_v63 = vcombine.high %v2377_v58, %v2393_v41  ;;  %v2417_v0 = vcombine.low %v2384_v59, %v2400_v60  ;;  %v2418_v1 = vcombine.high %v2384_v59, %v2400_v60 }
 0x4ff   :  { %v2409_v2 = vrot.slane %v2401_v61, %v6898_v38  ;;  %v2416_v4 = vrot.slane %v2402_v63, %v6898_v38  ;;  %v2425_v5 = vrot.slane %v2417_v0, %v6898_v38  ;;  %v2432_v62 = vrot.slane %v2418_v1, %v6898_v38  ;;  %v2675_v61 = vld [vmem:[%s7816_s3 + $0x10] sm:$0xff]  ;;  %v2676_v63 = vld [vmem:[%s7816_s3 + $0x18] sm:$0xff] }
 0x500   :  { %v6483_v0 = vpack.c.bf16 %v2676_v63, %v2675_v61  ;;  %v2894_v63 = vld [vmem:[%s7818_s5] sm:$0xff] }
 0x501   :  { %v2505_v6 = vcombine.low %v2409_v2, %v2416_v4  ;;  %v6008_v46 = vcombine.high %v2409_v2, %v2416_v4  ;;  %v2521_v47 = vcombine.low %v2425_v5, %v2432_v62  ;;  %v6009_v53 = vcombine.high %v2425_v5, %v2432_v62 }
 0x502   :  { %6484 = vmatprep.subr.bf16.mxu0 %v6483_v0 }
 0x503   :  { %v2512_v7 = vrot.slane %v2505_v6, %v6888_v31  ;;  %v2520_v8 = vrot.slane %v6008_v46, %v6888_v31  ;;  %v2528_v11 = vrot.slane %v2521_v47, %v6888_v31  ;;  %v2536_v55 = vrot.slane %v6009_v53, %v6888_v31  ;;  %6486 = vmatpush3.bf16.msra.mxu0 %v6483_v0  ;;  %v2895_v0 = vld [vmem:[%s7818_s5 + $0x8] sm:$0xff] }
 0x505   :  { %v2537_v56 = vcombine.low %v2512_v7, %v2520_v8  ;;  %v2553_v12 = vcombine.low %v2528_v11, %v2536_v55  ;;  %v2538_v13 = vcombine.high %v2512_v7, %v2520_v8  ;;  %v2554_v14 = vcombine.high %v2528_v11, %v2536_v55 }
 0x507   :  { %v7182_v19 = vrot.slane %v2537_v56, %v6898_v38  ;;  %v7185_v17 = vrot.slane %v2553_v12, %v6898_v38  ;;  %v2552_v24 = vrot.slane %v2538_v13, %v6898_v38  ;;  %v2568_v16 = vrot.slane %v2554_v14, %v6898_v38 }
 0x509   :  { %v2570_v25 = vcombine.high %v7182_v19, %v7185_v17  ;;  %v2569_v26 = vcombine.low %v7182_v19, %v7185_v17  ;;  %v2571_v18 = vcombine.low %v2552_v24, %v2568_v16  ;;  %v2572_v27 = vcombine.high %v2552_v24, %v2568_v16  ;;  %v7242_v17 = vld [vmem:[%s7819_s6] sm:$0xff] }
 0x50a   :  { %v2146_v28 = vpop.f32.mrb[10].mxu0  ;;  %v2219_v29 = vpop.f32.mrb[16].mxu1  ;;  %v2679_v19 = vsub.s32 2, %v6832_v9 }
 0x50b   :  { %2643 = vrot.lane.b32.xlu0 %v2570_v25, %s6734_s12  ;;  %v6282_v32 = vpop.f32.mrb[11].mxu0  ;;  %v6287_v33 = vpop.f32.mrb[17].mxu1 }
 0x50e   :  { %v2292_v34 = vpop.f32.mrb[12].mxu0  ;;  %v2365_v35 = vpop.f32.mrb[18].mxu1 }
 0x50f   :  { %v2437_v36 = vcombine.low %v2146_v28, %v2292_v34  ;;  %v2438_v37 = vcombine.high %v2146_v28, %v2292_v34  ;;  %v2453_v40 = vcombine.low %v2219_v29, %v2365_v35  ;;  %v2454_v42 = vcombine.high %v2219_v29, %v2365_v35  ;;  %2651 = vrot.lane.b32.xlu0 %v2571_v18, %s6736_s0  ;;  %v6292_v43 = vpop.f32.mrb[13].mxu0  ;;  %v6297_v48 = vpop.f32.mrb[19].mxu1 }
 0x510   :  { %v6649_v43 = vld [vmem:[#allocation2 + $0x8] sm:$0xff] }
 0x511   :  { %v2445_v49 = vrot.slane %v2437_v36, %v6888_v31  ;;  %v2452_v50 = vrot.slane %v2438_v37, %v6888_v31  ;;  %v2461_v51 = vrot.slane %v2453_v40, %v6888_v31  ;;  %v2468_v45 = vrot.slane %v2454_v42, %v6888_v31 }
 0x513   :  { %v2469_v3 = vcombine.low %v2445_v49, %v2461_v51  ;;  %v2470_v21 = vcombine.high %v2445_v49, %v2461_v51  ;;  %v2485_v20 = vcombine.low %v2452_v50, %v2468_v45  ;;  %v2486_v22 = vcombine.high %v2452_v50, %v2468_v45  ;;  %2659 = vrot.lane.b32.xlu0 %v2572_v27, %s6747_s21  ;;  %v6650_v49 = vld [vmem:[#allocation2] sm:$0xff] }
 0x515   :  { %v2477_v57 = vrot.slane %v2469_v3, %v6898_v38  ;;  %v2484_v30 = vrot.slane %v2470_v21, %v6898_v38  ;;  %v2493_v44 = vrot.slane %v2485_v20, %v6898_v38  ;;  %v2500_v39 = vrot.slane %v2486_v22, %v6898_v38 }
 0x517   :  { %v2573_v58 = vcombine.low %v2477_v57, %v2484_v30  ;;  %v6010_v59 = vcombine.high %v2477_v57, %v2484_v30  ;;  %v2589_v41 = vcombine.low %v2493_v44, %v2500_v39  ;;  %v6011_v60 = vcombine.high %v2493_v44, %v2500_v39  ;;  %v2803_v39 = vld [vmem:[%s7817_s4] sm:$0xff] }
 0x519   :  { %v2580_v1 = vrot.slane %v2573_v58, %v6888_v31  ;;  %v2588_v2 = vrot.slane %v6010_v59, %v6888_v31  ;;  %v2596_v4 = vrot.slane %v2589_v41, %v6888_v31  ;;  %v2604_v5 = vrot.slane %v6011_v60, %v6888_v31  ;;  %v2804_v58 = vld [vmem:[%s7817_s4 + $0x8] sm:$0xff]  ;;  %v2805_v41 = vld [vmem:[%s7817_s4 + $0x10] sm:$0xff]  ;;  %v2806_v60 = vld [vmem:[%s7817_s4 + $0x18] sm:$0xff] }
 0x51a   :  { %v6487_v59 = vpack.c.bf16 %v2804_v58, %v2803_v39  ;;  %v6491_v61 = vpack.c.bf16 %v2806_v60, %v2805_v41 }
 0x51b   :  { %v2605_v62 = vcombine.low %v2580_v1, %v2588_v2  ;;  %v2621_v6 = vcombine.low %v2596_v4, %v2604_v5  ;;  %v2606_v46 = vcombine.high %v2580_v1, %v2588_v2  ;;  %v2622_v47 = vcombine.high %v2596_v4, %v2604_v5  ;;  %v2896_v1 = vld [vmem:[%s7818_s5 + $0x10] sm:$0xff]  ;;  %v2897_v4 = vld [vmem:[%s7818_s5 + $0x18] sm:$0xff] }
 0x51c   :  { %6488 = vmatprep.subr.bf16.mxu1 %v6487_v59  ;;  %v6495_v2 = vpack.c.bf16 %v2895_v0, %v2894_v63  ;;  %v6499_v5 = vpack.c.bf16 %v2897_v4, %v2896_v1  ;;  %v6019_v0 = vld [vmem:[%s7815_s2 + $0x20] sm:$0xff]  ;;  %v6020_v1 = vld [vmem:[%s7815_s2 + $0x28] sm:$0xff]  ;;  %v6021_v4 = vld [vmem:[%s7815_s2 + $0x30] sm:$0xff] }
 0x51d   :  { %v2613_v53 = vrot.slane %v2605_v62, %v6898_v38  ;;  %v2629_v7 = vrot.slane %v2621_v6, %v6898_v38  ;;  %v2620_v8 = vrot.slane %v2606_v46, %v6898_v38  ;;  %v2636_v11 = vrot.slane %v2622_v47, %v6898_v38  ;;  %6490 = vmatpush3.bf16.msra.mxu1 %v6487_v59  ;;  %v2898_v62 = vld [vmem:[%s7818_s5 + $0x20] sm:$0xff]  ;;  %v2899_v6 = vld [vmem:[%s7818_s5 + $0x28] sm:$0xff] }
 0x51e   :  { %6492 = vmatprep.subr.bf16.mxu1 %v6491_v61  ;;  %6496 = vmatprep.subr.bf16.mxu0 %v6495_v2  ;;  %v6503_v46 = vpack.c.bf16 %v2899_v6, %v2898_v62 }
 0x51f   :  { %v2638_v55 = vcombine.high %v2613_v53, %v2629_v7  ;;  %v2637_v56 = vcombine.low %v2613_v53, %v2629_v7  ;;  %v2639_v12 = vcombine.low %v2620_v8, %v2636_v11  ;;  %v2640_v13 = vcombine.high %v2620_v8, %v2636_v11 }
 0x521   :  { %2645 = vrot.lane.b32.xlu1 %v2638_v55, %s6734_s12  ;;  %6494 = vmatpush3.bf16.msra.mxu1 %v6491_v61 }
 0x525   :  { %2653 = vrot.lane.b32.xlu1 %v2639_v12, %s6736_s0  ;;  %v2799_v12 = vsub.s32 5, %v6832_v9 }
 0x529   :  { %2661 = vrot.lane.b32.xlu1 %v2640_v13, %s6747_s21 }
 0x57d   :  { %v2644_v14 = vpop.permute.xlu0 %2643 }
 0x57e   :  { %v2665_v16 = vsel %vm1088_vm2, %v2569_v26, %v2644_v14  ;;  %v2680_v26 = vrot.slane %v7242_v17, %v2679_v19 }
 0x581   :  { %v2652_v24 = vpop.permute.xlu0 %2651 }
 0x582   :  { %v2668_v25 = vsel %vm2667_vm3, %v2665_v16, %v2652_v24  ;;  %v2800_v16 = vrot.slane %v7242_v17, %v2799_v12 }
 0x585   :  { %v2660_v18 = vpop.permute.xlu0 %2659 }
 0x586   :  { %v2671_v27 = vsel %vm2670_vm4, %v2668_v25, %v2660_v18 }
 0x587   :  { %6306 = vmatprep.mubr.msk.f32.mxu0 %vm74_vm0, %v2671_v27 }
 0x593   :  { %v2646_v28 = vpop.permute.xlu1 %2645 }
 0x594   :  { %v2666_v32 = vsel %vm1088_vm2, %v2637_v56, %v2646_v28  ;;  %v2793_v56 = vsub.s32 4, %v6832_v9 }
 0x596   :  { %v2794_v13 = vrot.slane %v7242_v17, %v2793_v56 }
 0x597   :  { %v2654_v29 = vpop.permute.xlu1 %2653 }
 0x598   :  { %v2669_v33 = vsel %vm2667_vm3, %v2666_v32, %v2654_v29 }
 0x59b   :  { %v2662_v34 = vpop.permute.xlu1 %2661 }
 0x59c   :  { %v2672_v35 = vsel %vm2670_vm4, %v2669_v33, %v2662_v34  ;;  %v2900_v33 = vld [vmem:[%s7818_s5 + $0x30] sm:$0xff]  ;;  %v2901_v34 = vld [vmem:[%s7818_s5 + $0x38] sm:$0xff] }
 0x59d   :  { %6307 = vmatmul.mubr.msk.f32.vlgmr.msra.gmra.mrb[14].mxu0 %vm74_vm0, %v2672_v35  ;;  %v6507_v35 = vpack.c.bf16 %v2901_v34, %v2900_v33  ;;  %v6018_v33 = vld [vmem:[%s7819_s6 + $0x8] sm:$0xff] }
 0x59e   :  { %6498 = vmatpush3.bf16.msra.mxu0 %v6495_v2  ;;  %v6511_v2 = vpack.c.bf16 %v6020_v1, %v6019_v0 }
 0x59f   :  { %6500 = vmatprep.subr.bf16.mxu0 %v6499_v5 }
 0x5a0   :  { %6512 = vmatprep.subr.bf16.mxu1 %v6511_v2 }
 0x5a2   :  { %6502 = vmatpush3.bf16.msra.mxu0 %v6499_v5  ;;  %v6022_v5 = vld [vmem:[%s7815_s2 + $0x38] sm:$0xff] }
 0x5a3   :  { %6504 = vmatprep.subr.bf16.mxu0 %v6503_v46  ;;  %v6515_v62 = vpack.c.bf16 %v6022_v5, %v6021_v4 }
 0x5a6   :  { %6506 = vmatpush3.bf16.msra.mxu0 %v6503_v46 }
 0x5a7   :  { %6508 = vmatprep.subr.bf16.mxu0 %v6507_v35 }
 0x5aa   :  { %6510 = vmatpush3.bf16.msra.mxu0 %v6507_v35 }
 0x5ab   :  { %6360 = vmatprep.subr.mxu0 %v6742_v23 }
 0x670   :  { %v6308_v36 = vpop.f32.mrb[14].mxu0 }
 0x671   :  { %v2759_v37 = vadd.f32 %v6308_v36, %v2680_v26  ;;  %v2753_v40 = vpop.f32.mrb[15].mxu0 }
 0x672   :  { %v2754_v42 = vadd.f32 %v2753_v40, %v2680_v26  ;;  %v2809_v26 = vsub.s32 1, %v6832_v9 }
 0x673   :  { %v2763_v48 = vadd.f32 %v6649_v43, %v2759_v37 }
 0x674   :  { %v2762_v50 = vadd.f32 %v6650_v49, %v2754_v42  ;;  %v2810_v36 = vrot.slane %v7242_v17, %v2809_v26 }
 0x675   :  { %v2767_v51 = vsel %vm74_vm0, %v2763_v48, 0.0 }
 0x676   :  { %2768 = vadd.xlane.f32.xlu1 %v2767_v51  ;;  %v2764_v45 = vsel %vm74_vm0, %v2762_v50, 0.0 }
 0x677   :  { %2765 = vadd.xlane.f32.xlu0 %v2764_v45 }
 0x703   :  { %v2769_v3 = vpop.xlane.xlu1 %2768 }
 0x704   :  { %v2772_v21 = vmul.f32 0.03125, %v2769_v3  ;;  %v2766_v20 = vpop.xlane.xlu0 %2765 }
 0x705   :  { %v2771_v22 = vmul.f32 0.03125, %v2766_v20 }
 0x706   :  { %v2774_v54 = vsub.f32 %v2763_v48, %v2772_v21 }
 0x707   :  { %v2773_v52 = vsub.f32 %v2762_v50, %v2771_v22  ;;  %v2904_v50 = vsub.s32 3, %v6832_v9 }
 0x708   :  { %v2776_v30 = vmul.f32 %v2774_v54, %v2774_v54 }
 0x709   :  { %v2775_v15 = vmul.f32 %v2773_v52, %v2773_v52  ;;  %v2905_v51 = vrot.slane %v7242_v17, %v2904_v50 }
 0x70a   :  { %v2780_v44 = vsel %vm74_vm0, %v2776_v30, 0.0 }
 0x70b   :  { %v2777_v57 = vsel %vm74_vm0, %v2775_v15, 0.0 }
 0x70c   :  { %2778 = vadd.xlane.f32.xlu0 %v2777_v57 }
 0x710   :  { %2781 = vadd.xlane.f32.xlu0 %v2780_v44 }
 0x799   :  { %v2779_v47 = vpop.xlane.xlu0 %2778 }
 0x79a   :  { %v2783_v53 = vmul.f32 0.03125, %v2779_v47 }
 0x79c   :  { %v2785_v7 = vadd.f32 1e-05, %v2783_v53 }
 0x79d   :  { %v2782_v8 = vpop.xlane.xlu0 %2781 }
 0x79e   :  { %6600 = vrsqrt.f32 %v2785_v7  ;;  %v2784_v11 = vmul.f32 0.03125, %v2782_v8 }
 0x7a0   :  { %v2786_v55 = vadd.f32 1e-05, %v2784_v11  ;;  %v3018_v11 = vsub.s32 6, %v6832_v9 }
 0x7a2   :  { %6602 = vrsqrt.f32 %v2786_v55  ;;  %v3024_v55 = vsub.s32 7, %v6832_v9 }
 0x7a8   :  { %v6601_v14 = vpop.eup %6600 }
 0x7a9   :  { %v2789_v24 = vmul.f32 %v6601_v14, %v2773_v52 }
 0x7ab   :  { %v2795_v25 = vmul.f32 %v2794_v13, %v2789_v24 }
 0x7ac   :  { %v6603_v18 = vpop.eup %6602 }
 0x7ad   :  { %v2790_v27 = vmul.f32 %v6603_v18, %v2774_v54  ;;  %v2801_v28 = vadd.f32 %v2800_v16, %v2795_v25  ;;  %v3025_v18 = vrot.slane %v7242_v17, %v3024_v55 }
 0x7af   :  { %v2796_v29 = vmul.f32 %v2794_v13, %v2790_v27  ;;  %6317 = vmatprep.mubr.msk.f32.mxu1 %vm74_vm0, %v2801_v28  ;;  %v3019_v13 = vrot.slane %v7242_v17, %v3018_v11  ;;  %v3038_v17 = vrot.slane %v6018_v33, %v72_v10 }
 0x7b1   :  { %v2802_v32 = vadd.f32 %v2800_v16, %v2796_v29 }
 0x7b3   :  { %6318 = vmatmul.mubr.msk.f32.vlgmr.msra.gmra.mrb[20].mxu1 %vm74_vm0, %v2802_v32 }
 0x7b4   :  { %6514 = vmatpush3.bf16.msra.mxu1 %v6511_v2 }
 0x7b5   :  { %6516 = vmatprep.subr.bf16.mxu1 %v6515_v62 }
 0x7b8   :  { %6518 = vmatpush3.bf16.msra.mxu1 %v6515_v62 }
 0x7b9   :  { %6350 = vmatprep.subr.mxu1 %v6742_v23 }
 0x886   :  { %v6319_v37 = vpop.f32.mrb[20].mxu1 }
 0x887   :  { %v2889_v40 = vadd.f32 %v6319_v37, %v2810_v36  ;;  %v2883_v42 = vpop.f32.mrb[21].mxu1 }
 0x888   :  { %v2884_v43 = vadd.f32 %v2883_v42, %v2810_v36 }
 0x889   :  { %v2893_v49 = vmax.f32 %v2889_v40, 0.0 }
 0x88a   :  { %v2892_v48 = vmax.f32 %v2884_v43, 0.0 }
 0x88c   :  { %6336 = vmatprep.mubr.msk.f32.mxu0 %vm2906_vm5, %v2892_v48 }
 0x88d   :  { %6337 = vmatmul.mubr.msk.f32.vlgmr.msra.gmra.mrb[16].mxu0 %vm2906_vm5, %v2893_v49 }
 0x88e   :  { %6362 = vmatprep.mubr.msk.f32.mxu0 %vm6744_vm1, %v6742_v23 }
 0x960   :  { %v6338_v45 = vpop.f32.mrb[16].mxu0 }
 0x961   :  { %v2985_v3 = vadd.f32 %v6338_v45, %v2905_v51  ;;  %v2979_v21 = vpop.f32.mrb[17].mxu0 }
 0x962   :  { %v2980_v20 = vadd.f32 %v2979_v21, %v2905_v51 }
 0x963   :  { %v2989_v22 = vadd.f32 %v2985_v3, %v2802_v32 }
 0x964   :  { %v2988_v54 = vadd.f32 %v2980_v20, %v2801_v28 }
 0x965   :  { %v2993_v52 = vsel %vm74_vm0, %v2989_v22, 0.0 }
 0x966   :  { %2994 = vadd.xlane.f32.xlu0 %v2993_v52  ;;  %v2990_v15 = vsel %vm74_vm0, %v2988_v54, 0.0 }
 0x967   :  { %2991 = vadd.xlane.f32.xlu1 %v2990_v15 }
 0x9f3   :  { %v2995_v57 = vpop.xlane.xlu0 %2994 }
 0x9f4   :  { %v2997_v30 = vmul.f32 0.03125, %v2995_v57  ;;  %v2992_v44 = vpop.xlane.xlu1 %2991 }
 0x9f5   :  { %v2996_v39 = vmul.f32 0.03125, %v2992_v44 }
 0x9f6   :  { %v2999_v58 = vsub.f32 %v2989_v22, %v2997_v30 }
 0x9f7   :  { %v2998_v59 = vsub.f32 %v2988_v54, %v2996_v39 }
 0x9f8   :  { %v3001_v41 = vmul.f32 %v2999_v58, %v2999_v58 }
 0x9f9   :  { %v3000_v60 = vmul.f32 %v2998_v59, %v2998_v59 }
 0x9fa   :  { %v3005_v61 = vsel %vm74_vm0, %v3001_v41, 0.0 }
 0x9fb   :  { %3006 = vadd.xlane.f32.xlu0 %v3005_v61  ;;  %v3002_v63 = vsel %vm74_vm0, %v3000_v60, 0.0 }
 0x9fc   :  { %3003 = vadd.xlane.f32.xlu1 %v3002_v63 }
 0xa88   :  { %v3007_v6 = vpop.xlane.xlu0 %3006 }
 0xa89   :  { %v3009_v46 = vmul.f32 0.03125, %v3007_v6  ;;  %v3004_v47 = vpop.xlane.xlu1 %3003 }
 0xa8a   :  { %v3008_v53 = vmul.f32 0.03125, %v3004_v47 }
 0xa8b   :  { %v3011_v7 = vadd.f32 1e-05, %v3009_v46 }
 0xa8c   :  { %v3010_v8 = vadd.f32 1e-05, %v3008_v53 }
 0xa8d   :  { %6604 = vrsqrt.f32 %v3011_v7 }
 0xa8e   :  { %6606 = vrsqrt.f32 %v3010_v8 }
 0xa97   :  { %v6605_v14 = vpop.eup %6604 }
 0xa98   :  { %v6607_v24 = vpop.eup %6606  ;;  %v3015_v16 = vmul.f32 %v6605_v14, %v2999_v58 }
 0xa99   :  { %v3014_v25 = vmul.f32 %v6607_v24, %v2998_v59 }
 0xa9a   :  { %v3021_v27 = vmul.f32 %v3019_v13, %v3015_v16 }
 0xa9b   :  { %v3020_v28 = vmul.f32 %v3019_v13, %v3014_v25 }
 0xa9c   :  { %v7337_v32 = vadd.f32 %v3025_v18, %v3021_v27 }
 0xa9d   :  { %v7335_v29 = vadd.f32 %v3025_v18, %v3020_v28 }
 0xa9f   :  { %6347 = vmatprep.mubr.msk.f32.mxu1 %vm74_vm0, %v7335_v29 }
 0xaa0   :  { %6348 = vmatmul.mubr.msk.f32.vlgmr.msra.gmra.mrb[22].mxu1 %vm74_vm0, %v7337_v32 }
 0xaa1   :  { %6352 = vmatprep.mubr.msk.f32.mxu1 %vm6744_vm1, %v6742_v23 }
 0xb73   :  { %v6349_v34 = vpop.f32.mrb[22].mxu1 }
 0xb74   :  { %v3111_v35 = vpop.f32.mrb[23].mxu1  ;;  %v7352_v37 = vadd.f32 %v6349_v34, %v3038_v17 }
 0xb75   :  { %v3112_v36 = vadd.f32 %v3111_v35, %v3038_v17 }
 0xb77   :  { %3128 = vrot.lane.b32.xlu0 %v3112_v36, %s6740_s18  ;;  %3122 = vrot.lane.b32.xlu1 %v3112_v36, %s6739_s17 }
 0xb7b   :  { %3130 = vrot.lane.b32.xlu0 %v7352_v37, %s6740_s18  ;;  %3134 = vrot.lane.b32.xlu1 %v3112_v36, %s6738_s16 }
 0xb7f   :  { %3412 = vrot.lane.b32.xlu0 %v3112_v36, %s6741_s19  ;;  %3124 = vrot.lane.b32.xlu1 %v7352_v37, %s6739_s17 }
 0xb83   :  { %3136 = vrot.lane.b32.xlu1 %v7352_v37, %s6738_s16 }
 0xbe9   :  { %v7362_v10 = vpop.permute.xlu0 %3128  ;;  %v7364_v40 = vpop.permute.xlu1 %3122 }
 0xbea   :  { %3420 = vrot.lane.b32.xlu0 %v7362_v10, %s6741_s19  ;;  %3416 = vrot.lane.b32.xlu1 %v7364_v40, %s6741_s19  ;;  %v3140_v3 = vcombine.low %v3112_v36, %v7362_v10  ;;  %v3141_v21 = vcombine.high %v3112_v36, %v7362_v10 }
 0xbec   :  { %v3148_v54 = vrot.slane %v3140_v3, %v6888_v31  ;;  %v3155_v52 = vrot.slane %v3141_v21, %v6888_v31 }
 0xbed   :  { %v7370_v42 = vpop.permute.xlu1 %3134  ;;  %v7376_v43 = vpop.permute.xlu0 %3130 }
 0xbee   :  { %3414 = vrot.lane.b32.xlu0 %v7352_v37, %s6741_s19  ;;  %3424 = vrot.lane.b32.xlu1 %v7370_v42, %s6741_s19  ;;  %v3156_v51 = vcombine.low %v7364_v40, %v7370_v42  ;;  %v3157_v45 = vcombine.high %v7364_v40, %v7370_v42  ;;  %v3208_v61 = vcombine.low %v7352_v37, %v7376_v43 }
 0xbef   :  { %v3209_v62 = vcombine.high %v7352_v37, %v7376_v43 }
 0xbf0   :  { %v3164_v20 = vrot.slane %v3156_v51, %v6888_v31  ;;  %v3171_v22 = vrot.slane %v3157_v45, %v6888_v31  ;;  %v3216_v46 = vrot.slane %v3208_v61, %v6888_v31 }
 0xbf1   :  { %v7378_v48 = vpop.permute.xlu1 %3124  ;;  %v3413_v0 = vpop.permute.xlu0 %3412  ;;  %v3223_v16 = vrot.slane %v3209_v62, %v6888_v31 }
 0xbf2   :  { %3422 = vrot.lane.b32.xlu0 %v7376_v43, %s6741_s19  ;;  %3418 = vrot.lane.b32.xlu1 %v7378_v48, %s6741_s19  ;;  %v3172_v15 = vcombine.low %v3148_v54, %v3164_v20  ;;  %v3173_v57 = vcombine.high %v3148_v54, %v3164_v20  ;;  %v3188_v30 = vcombine.low %v3155_v52, %v3171_v22 }
 0xbf3   :  { %v3189_v44 = vcombine.high %v3155_v52, %v3171_v22 }
 0xbf4   :  { %v3180_v39 = vrot.slane %v3172_v15, %v6898_v38  ;;  %v3187_v58 = vrot.slane %v3173_v57, %v6898_v38  ;;  %v3196_v59 = vrot.slane %v3188_v30, %v6898_v38 }
 0xbf5   :  { %v7384_v49 = vpop.permute.xlu1 %3136  ;;  %v3203_v41 = vrot.slane %v3189_v44, %v6898_v38 }
 0xbf6   :  { %3426 = vrot.lane.b32.xlu1 %v7384_v49, %s6741_s19  ;;  %v3224_v60 = vcombine.low %v7378_v48, %v7384_v49  ;;  %v3276_v63 = vcombine.low %v3180_v39, %v3187_v58  ;;  %v6025_v1 = vcombine.high %v3180_v39, %v3187_v58  ;;  %v3225_v5 = vcombine.high %v7378_v48, %v7384_v49 }
 0xbf7   :  { %v3292_v2 = vcombine.low %v3196_v59, %v3203_v41  ;;  %v6026_v4 = vcombine.high %v3196_v59, %v3203_v41 }
 0xbf8   :  { %v3232_v6 = vrot.slane %v3224_v60, %v6888_v31  ;;  %v3283_v47 = vrot.slane %v3276_v63, %v6888_v31  ;;  %v3291_v8 = vrot.slane %v6025_v1, %v6888_v31  ;;  %v3239_v24 = vrot.slane %v3225_v5, %v6888_v31 }
 0xbf9   :  { %v3299_v13 = vrot.slane %v3292_v2, %v6888_v31  ;;  %v3307_v14 = vrot.slane %v6026_v4, %v6888_v31 }
 0xbfa   :  { %3708 = vrot.lane.b32.xlu1 %v3112_v36, %s6743_s20  ;;  %v3240_v25 = vcombine.low %v3216_v46, %v3232_v6  ;;  %v3241_v18 = vcombine.high %v3216_v46, %v3232_v6  ;;  %v3256_v17 = vcombine.low %v3223_v16, %v3239_v24  ;;  %v3257_v34 = vcombine.high %v3223_v16, %v3239_v24 }
 0xbfb   :  { %v3308_v36 = vcombine.low %v3283_v47, %v3291_v8  ;;  %v3324_v51 = vcombine.low %v3299_v13, %v3307_v14  ;;  %v3309_v22 = vcombine.high %v3283_v47, %v3291_v8  ;;  %v3325_v54 = vcombine.high %v3299_v13, %v3307_v14 }
 0xbfc   :  { %v3248_v21 = vrot.slane %v3240_v25, %v6898_v38  ;;  %v3255_v20 = vrot.slane %v3241_v18, %v6898_v38  ;;  %v3264_v44 = vrot.slane %v3256_v17, %v6898_v38  ;;  %v3271_v39 = vrot.slane %v3257_v34, %v6898_v38 }
 0xbfd   :  { %v7428_v59 = vrot.slane %v3308_v36, %v6898_v38  ;;  %v7431_v41 = vrot.slane %v3324_v51, %v6898_v38  ;;  %v7434_v5 = vrot.slane %v3309_v22, %v6898_v38  ;;  %v7437_v62 = vrot.slane %v3325_v54, %v6898_v38 }
 0xbfe   :  { %v3344_v2 = vcombine.low %v3248_v21, %v3255_v20  ;;  %v6027_v4 = vcombine.high %v3248_v21, %v3255_v20  ;;  %v6028_v8 = vcombine.high %v3264_v44, %v3271_v39 }
 0xc00   :  { %v7447_v17 = vrot.slane %v6027_v4, %v6888_v31 }
 0xc5c   :  { %v3421_v53 = vpop.permute.xlu0 %3420  ;;  %v3417_v7 = vpop.permute.xlu1 %3416 }
 0xc5d   :  { %v3436_v27 = vcombine.low %v3413_v0, %v3421_v53  ;;  %v3437_v28 = vcombine.high %v3413_v0, %v3421_v53 }
 0xc5f   :  { %v3444_v52 = vrot.slane %v3436_v27, %v6888_v31  ;;  %v3451_v15 = vrot.slane %v3437_v28, %v6888_v31  ;;  %v7444_v28 = vrot.slane %v3344_v2, %v6888_v31 }
 0xc60   :  { %v3415_v33 = vpop.permute.xlu0 %3414  ;;  %v3425_v35 = vpop.permute.xlu1 %3424 }
 0xc61   :  { %v3452_v45 = vcombine.low %v3417_v7, %v3425_v35  ;;  %v3453_v3 = vcombine.high %v3417_v7, %v3425_v35  ;;  %v3360_v7 = vcombine.low %v3264_v44, %v3271_v39 }
 0xc63   :  { %v3460_v57 = vrot.slane %v3452_v45, %v6888_v31  ;;  %v3467_v30 = vrot.slane %v3453_v3, %v6888_v31 }
 0xc64   :  { %v3419_v58 = vpop.permute.xlu1 %3418  ;;  %v3423_v1 = vpop.permute.xlu0 %3422 }
 0xc65   :  { %v3468_v60 = vcombine.low %v3444_v52, %v3460_v57  ;;  %v3469_v61 = vcombine.high %v3444_v52, %v3460_v57  ;;  %v3484_v63 = vcombine.low %v3451_v15, %v3467_v30  ;;  %v3485_v0 = vcombine.high %v3451_v15, %v3467_v30 }
 0xc66   :  { %v3504_v13 = vcombine.low %v3415_v33, %v3423_v1  ;;  %v3505_v14 = vcombine.high %v3415_v33, %v3423_v1 }
 0xc67   :  { %v3476_v6 = vrot.slane %v3468_v60, %v6898_v38  ;;  %v3483_v46 = vrot.slane %v3469_v61, %v6898_v38  ;;  %v3492_v47 = vrot.slane %v3484_v63, %v6898_v38  ;;  %v3499_v53 = vrot.slane %v3485_v0, %v6898_v38 }
 0xc68   :  { %v3427_v24 = vpop.permute.xlu1 %3426  ;;  %v3512_v3 = vrot.slane %v3504_v13, %v6888_v31  ;;  %v3519_v21 = vrot.slane %v3505_v14, %v6888_v31 }
 0xc69   :  { %v3572_v16 = vcombine.low %v3476_v6, %v3483_v46  ;;  %v6029_v25 = vcombine.high %v3476_v6, %v3483_v46  ;;  %v3588_v18 = vcombine.low %v3492_v47, %v3499_v53  ;;  %v6030_v27 = vcombine.high %v3492_v47, %v3499_v53 }
 0xc6a   :  { %v3520_v34 = vcombine.low %v3419_v58, %v3427_v24  ;;  %v3521_v35 = vcombine.high %v3419_v58, %v3427_v24  ;;  %v3367_v46 = vrot.slane %v3360_v7, %v6888_v31  ;;  %v3375_v47 = vrot.slane %v6028_v8, %v6888_v31 }
 0xc6b   :  { %v3579_v36 = vrot.slane %v3572_v16, %v6888_v31  ;;  %v3587_v51 = vrot.slane %v6029_v25, %v6888_v31  ;;  %v3595_v45 = vrot.slane %v3588_v18, %v6888_v31  ;;  %v3603_v33 = vrot.slane %v6030_v27, %v6888_v31 }
 0xc6c   :  { %v3528_v20 = vrot.slane %v3520_v34, %v6888_v31  ;;  %v3535_v22 = vrot.slane %v3521_v35, %v6888_v31  ;;  %v3340_v18 = vcombine.low %v7428_v59, %v7431_v41  ;;  %v3342_v35 = vcombine.low %v7434_v5, %v7437_v62 }
 0xc6d   :  { %v3604_v54 = vcombine.low %v3579_v36, %v3587_v51  ;;  %v3605_v52 = vcombine.high %v3579_v36, %v3587_v51  ;;  %v3620_v15 = vcombine.low %v3595_v45, %v3603_v33  ;;  %v3621_v57 = vcombine.high %v3595_v45, %v3603_v33 }
 0xc6e   :  { %v3536_v30 = vcombine.low %v3512_v3, %v3528_v20  ;;  %v3537_v44 = vcombine.high %v3512_v3, %v3528_v20  ;;  %v3552_v39 = vcombine.low %v3519_v21, %v3535_v22  ;;  %v3553_v58 = vcombine.high %v3519_v21, %v3535_v22 }
 0xc6f   :  { %v3612_v60 = vrot.slane %v3604_v54, %v6898_v38  ;;  %v3628_v61 = vrot.slane %v3620_v15, %v6898_v38  ;;  %v3619_v63 = vrot.slane %v3605_v52, %v6898_v38  ;;  %v3635_v0 = vrot.slane %v3621_v57, %v6898_v38 }
 0xc70   :  { %v3544_v1 = vrot.slane %v3536_v30, %v6898_v38  ;;  %v3551_v2 = vrot.slane %v3537_v44, %v6898_v38  ;;  %v3560_v4 = vrot.slane %v3552_v39, %v6898_v38  ;;  %v3567_v6 = vrot.slane %v3553_v58, %v6898_v38 }
 0xc71   :  { %v3636_v53 = vcombine.low %v3612_v60, %v3628_v61  ;;  %v3638_v13 = vcombine.low %v3619_v63, %v3635_v0  ;;  %v3637_v36 = vcombine.high %v3612_v60, %v3628_v61  ;;  %v3376_v51 = vcombine.low %v7444_v28, %v7447_v17 }
 0xc72   :  { %v3640_v14 = vcombine.low %v3544_v1, %v3551_v2  ;;  %v6031_v24 = vcombine.high %v3544_v1, %v3551_v2  ;;  %v3656_v16 = vcombine.low %v3560_v4, %v3567_v6  ;;  %v6032_v25 = vcombine.high %v3560_v4, %v3567_v6  ;;  %v6651_v6 = vld [vmem:[#allocation5] ss:$0 sm:$0xff] }
 0xc73   :  { %6351 = vmatpush3.xpose.msk.msra.mxu1 %vm1088_vm2, %v3636_v53  ;;  %6361 = vmatpush3.xpose.msk.msra.mxu0 %vm1088_vm2, %v3638_v13  ;;  %v3392_v45 = vcombine.low %v3367_v46, %v3375_v47  ;;  %v3341_v22 = vcombine.high %v7428_v59, %v7431_v41  ;;  %v3377_v15 = vcombine.high %v7444_v28, %v7447_v17 }
 0xc74   :  { %v3647_v27 = vrot.slane %v3640_v14, %v6888_v31  ;;  %v3655_v34 = vrot.slane %v6031_v24, %v6888_v31  ;;  %v3663_v7 = vrot.slane %v3656_v16, %v6888_v31  ;;  %v3671_v8 = vrot.slane %v6032_v25, %v6888_v31  ;;  %6355 = vmatprep.subr.mxu1 %v6742_v23  ;;  %v6652_v14 = vld [vmem:[#allocation5 + $0x2] ss:$0 sm:$0xff] }
 0xc75   :  { %6370 = vmatprep.subr.mxu0 %v6742_v23  ;;  %v3639_v57 = vcombine.high %v3619_v63, %v3635_v0  ;;  %v3384_v30 = vrot.slane %v3376_v51, %v6898_v38  ;;  %v3400_v59 = vrot.slane %v3392_v45, %v6898_v38  ;;  %v3393_v41 = vcombine.high %v3367_v46, %v3375_v47 }
 0xc76   :  { %v3672_v33 = vcombine.low %v3647_v27, %v3655_v34  ;;  %v3673_v3 = vcombine.high %v3647_v27, %v3655_v34  ;;  %v3688_v21 = vcombine.low %v3663_v7, %v3671_v8  ;;  %v3689_v20 = vcombine.high %v3663_v7, %v3671_v8  ;;  %6353 = vmatmul.mubr.msk.f32.vlgmr.msra.gmra.mrb[24].mxu1 %vm1088_vm2, %v3340_v18  ;;  %v6653_v18 = vld [vmem:[#allocation5 + $0x1] ss:$0 sm:$0xff] }
 0xc77   :  { %6363 = vmatmul.mubr.msk.f32.vlgmr.msra.gmra.mrb[18].mxu0 %vm1088_vm2, %v3342_v35  ;;  %6356 = vmatpush3.xpose.msk.msra.mxu1 %vm1088_vm2, %v3637_v36  ;;  %v3343_v28 = vcombine.high %v7434_v5, %v7437_v62  ;;  %v3408_v17 = vcombine.low %v3384_v30, %v3400_v59  ;;  %v3391_v61 = vrot.slane %v3377_v15, %v6898_v38  ;;  %v6654_v36 = vld [vmem:[#allocation5 + $0x3] ss:$0 sm:$0xff]  ;;  %v6656_v15 = vld [vmem:[#allocation5 + $0x5] ss:$0 sm:$0xff] }
 0xc78   :  { %6357 = vmatprep.mubr.msk.f32.mxu1 %vm6744_vm1, %v6742_v23  ;;  %6365 = vmatprep.subr.mxu1 %v6742_v23  ;;  %v3680_v54 = vrot.slane %v3672_v33, %v6898_v38  ;;  %v3696_v52 = vrot.slane %v3688_v21, %v6898_v38  ;;  %v3687_v39 = vrot.slane %v3673_v3, %v6898_v38  ;;  %v6655_v3 = vld [vmem:[#allocation5 + $0x4] ss:$0 sm:$0xff] }
 0xc79   :  { %6372 = vmatprep.mubr.msk.f32.mxu0 %vm6744_vm1, %v6742_v23  ;;  %v3703_v58 = vrot.slane %v3689_v20, %v6898_v38  ;;  %v3407_v63 = vrot.slane %v3393_v41, %v6898_v38  ;;  %v3409_v5 = vcombine.high %v3384_v30, %v3400_v59  ;;  %v6657_v41 = vld [vmem:[#allocation5 + $0x6] ss:$0 sm:$0xff] }
 0xc7a   :  { %6358 = vmatmul.mubr.msk.f32.vlgmr.msra.gmra.mrb[26].mxu1 %vm1088_vm2, %v3341_v22  ;;  %v3704_v44 = vcombine.low %v3680_v54, %v3696_v52  ;;  %v3705_v60 = vcombine.high %v3680_v54, %v3696_v52 }
 0xc7b   :  { %6366 = vmatpush3.xpose.msk.msra.mxu1 %vm1088_vm2, %v3639_v57  ;;  %6367 = vmatprep.mubr.msk.f32.mxu1 %vm6744_vm1, %v6742_v23  ;;  %v3706_v0 = vcombine.low %v3687_v39, %v3703_v58  ;;  %v3410_v62 = vcombine.low %v3391_v61, %v3407_v63  ;;  %v3707_v1 = vcombine.high %v3687_v39, %v3703_v58 }
 0xc7c   :  { %6371 = vmatpush3.xpose.msk.msra.mxu0 %vm1088_vm2, %v3704_v44  ;;  %6375 = vmatprep.subr.mxu1 %v6742_v23  ;;  %v3411_v2 = vcombine.high %v3391_v61, %v3407_v63 }
 0xc7d   :  { %6380 = vmatprep.subr.mxu0 %v6742_v23 }
 0xc7e   :  { %6368 = vmatmul.mubr.msk.f32.vlgmr.msra.gmra.mrb[28].mxu1 %vm1088_vm2, %v3343_v28 }
 0xc7f   :  { %6373 = vmatmul.mubr.msk.f32.vlgmr.msra.gmra.mrb[20].mxu0 %vm1088_vm2, %v3408_v17  ;;  %6376 = vmatpush3.xpose.msk.msra.mxu1 %vm1088_vm2, %v3705_v60  ;;  %v6658_v60 = vld [vmem:[#allocation5 + $0x7] ss:$0 sm:$0xff] }
 0xc80   :  { %6381 = vmatpush3.xpose.msk.msra.mxu0 %vm1088_vm2, %v3706_v0  ;;  %6377 = vmatprep.mubr.msk.f32.mxu1 %vm6744_vm1, %v6742_v23 }
 0xc81   :  { %6382 = vmatprep.mubr.msk.f32.mxu0 %vm6744_vm1, %v6742_v23  ;;  %6385 = vmatprep.subr.mxu1 %v6742_v23 }
 0xc82   :  { %6378 = vmatmul.mubr.msk.f32.vlgmr.msra.gmra.mrb[30].mxu1 %vm1088_vm2, %v3409_v5  ;;  %6390 = vmatprep.subr.mxu0 %v6742_v23  ;;  %v3709_v5 = vpop.permute.xlu1 %3708 }
 0xc83   :  { %6383 = vmatmul.mubr.msk.f32.vlgmr.msra.gmra.mrb[22].mxu0 %vm1088_vm2, %v3410_v62  ;;  %6386 = vmatpush3.xpose.msk.msra.mxu1 %vm1088_vm2, %v3707_v1 }
 0xc84   :  { %6387 = vmatprep.mubr.msk.f32.mxu1 %vm6744_vm1, %v6742_v23  ;;  %6395 = vmatprep.subr.mxu1 %v6742_v23 }
 0xc85   :  { %6392 = vmatprep.mubr.msk.f32.mxu0 %vm6744_vm1, %v6742_v23 }
 0xc86   :  { %6388 = vmatmul.mubr.msk.f32.vlgmr.msra.gmra.mrb[32].mxu1 %vm1088_vm2, %v3411_v2 }
 0xc87   :  { %6397 = vmatprep.mubr.msk.f32.mxu1 %vm6744_vm1, %v6742_v23 }
 0xd49   :  { %v4076_v4 = vpop.f32.mrb[24].mxu1 }
 0xd4a   :  { %v4077_v46 = vadd.f32 %v6651_v6, %v4076_v4  ;;  %v4228_v47 = vpop.f32.mrb[18].mxu0  ;;  %v6354_v53 = vpop.f32.mrb[25].mxu1 }
 0xd4b   :  { %v6364_v13 = vpop.f32.mrb[19].mxu0  ;;  %v4229_v24 = vadd.f32 %v6652_v14, %v4228_v47 }
 0xd4c   :  { %v4612_v16 = vsel %vm1088_vm2, %v4077_v46, -inf }
 0xd4d   :  { %4613 = vmax.xlane.f32.xlu0 %v4612_v16  ;;  %v4152_v25 = vpop.f32.mrb[26].mxu1  ;;  %v4618_v7 = vsel %vm1088_vm2, %v4229_v24, -inf }
 0xd4e   :  { %v4153_v27 = vadd.f32 %v6653_v18, %v4152_v25  ;;  %v6359_v34 = vpop.f32.mrb[27].mxu1 }
 0xd50   :  { %v4615_v8 = vsel %vm1088_vm2, %v4153_v27, -inf }
 0xd51   :  { %4619 = vmax.xlane.f32.xlu0 %v4618_v7  ;;  %4616 = vmax.xlane.f32.xlu1 %v4615_v8  ;;  %v4304_v35 = vpop.f32.mrb[28].mxu1 }
 0xd52   :  { %v4305_v51 = vadd.f32 %v6654_v36, %v4304_v35  ;;  %v4380_v45 = vpop.f32.mrb[20].mxu0  ;;  %v6369_v33 = vpop.f32.mrb[29].mxu1 }
 0xd53   :  { %v4381_v21 = vadd.f32 %v6655_v3, %v4380_v45  ;;  %v6374_v20 = vpop.f32.mrb[21].mxu0 }
 0xd54   :  { %v4621_v22 = vsel %vm1088_vm2, %v4305_v51, -inf }
 0xd55   :  { %4622 = vmax.xlane.f32.xlu0 %v4621_v22  ;;  %v4456_v54 = vpop.f32.mrb[30].mxu1  ;;  %v4624_v52 = vsel %vm1088_vm2, %v4381_v21, -inf }
 0xd56   :  { %v4457_v57 = vadd.f32 %v6656_v15, %v4456_v54  ;;  %4625 = vmax.xlane.f32.xlu1 %v4624_v52  ;;  %v4532_v30 = vpop.f32.mrb[22].mxu0  ;;  %v6379_v59 = vpop.f32.mrb[31].mxu1 }
 0xd57   :  { %v4533_v44 = vadd.f32 %v6657_v41, %v4532_v30  ;;  %v6384_v39 = vpop.f32.mrb[23].mxu0 }
 0xd58   :  { %v4627_v58 = vsel %vm1088_vm2, %v4457_v57, -inf }
 0xd59   :  { %4628 = vmax.xlane.f32.xlu0 %v4627_v58  ;;  %v4608_v28 = vpop.f32.mrb[32].mxu1  ;;  %v4630_v17 = vsel %vm1088_vm2, %v4533_v44, -inf }
 0xd5a   :  { %v4609_v61 = vadd.f32 %v6658_v60, %v4608_v28  ;;  %4631 = vmax.xlane.f32.xlu1 %v4630_v17  ;;  %v6389_v63 = vpop.f32.mrb[33].mxu1 }
 0xd5c   :  { %v4633_v0 = vsel %vm1088_vm2, %v4609_v61, -inf }
 0xd5d   :  { %4634 = vmax.xlane.f32.xlu0 %v4633_v0 }
 0xd6b   :  { %3716 = vrot.lane.b32.xlu1 %v7362_v10, %s6743_s20 }
 0xd6f   :  { %3720 = vrot.lane.b32.xlu1 %v7370_v42, %s6743_s20 }
 0xd73   :  { %3710 = vrot.lane.b32.xlu1 %v7352_v37, %s6743_s20  ;;  %3712 = vrot.lane.b32.xlu0 %v7364_v40, %s6743_s20 }
 0xdda   :  { %v4614_v62 = vpop.xlane.xlu0 %4613 }
 0xddb   :  { %v4636_v1 = vsub.f32 %v4077_v46, %v4614_v62 }
 0xddd   :  { %v4644_v2 = vmul.f32 1.442695, %v4636_v1 }
 0xdde   :  { %v4620_v4 = vpop.xlane.xlu0 %4619  ;;  %v4617_v6 = vpop.xlane.xlu1 %4616 }
 0xddf   :  { %6608 = vpow2.f32 %v4644_v2  ;;  %v4638_v47 = vsub.f32 %v4229_v24, %v4620_v4  ;;  %v4637_v53 = vsub.f32 %v4153_v27, %v4617_v6 }
 0xde1   :  { %v4648_v13 = vmul.f32 1.442695, %v4638_v47  ;;  %v4646_v10 = vmul.f32 1.442695, %v4637_v53 }
 0xde2   :  { %v4623_v14 = vpop.xlane.xlu0 %4622 }
 0xde3   :  { %6610 = vpow2.f32 %v4648_v13  ;;  %v4639_v42 = vsub.f32 %v4305_v51, %v4623_v14  ;;  %v4626_v16 = vpop.xlane.xlu1 %4625 }
 0xde4   :  { %6612 = vpow2.f32 %v4646_v10  ;;  %v4640_v37 = vsub.f32 %v4381_v21, %v4626_v16 }
 0xde5   :  { %v4650_v25 = vmul.f32 1.442695, %v4639_v42 }
 0xde6   :  { %v4652_v18 = vmul.f32 1.442695, %v4640_v37  ;;  %v4629_v40 = vpop.xlane.xlu0 %4628 }
 0xde7   :  { %v4641_v34 = vsub.f32 %v4457_v57, %v4629_v40  ;;  %v4632_v7 = vpop.xlane.xlu1 %4631 }
 0xde8   :  { %6614 = vpow2.f32 %v4652_v18  ;;  %v4642_v46 = vsub.f32 %v4533_v44, %v4632_v7 }
 0xde9   :  { %v7547_v8 = vpop.eup %6608  ;;  %v4654_v35 = vmul.f32 1.442695, %v4641_v34  ;;  %6616 = vpow2.f32 %v4650_v25 }
 0xdea   :  { %v4656_v24 = vmul.f32 1.442695, %v4642_v46  ;;  %v4635_v27 = vpop.xlane.xlu0 %4634  ;;  %v4660_v36 = vsel %vm1088_vm2, %v7547_v8, 0.0 }
 0xdeb   :  { %6618 = vpow2.f32 %v4654_v35  ;;  %v4643_v51 = vsub.f32 %v4609_v61, %v4635_v27  ;;  %v3717_v45 = vpop.permute.xlu1 %3716  ;;  %4661 = vadd.xlane.f32.xlu1 %v4660_v36 }
 0xdec   :  { %v3732_v3 = vcombine.low %v3709_v5, %v3717_v45  ;;  %6620 = vpow2.f32 %v4656_v24  ;;  %v3733_v22 = vcombine.high %v3709_v5, %v3717_v45 }
 0xded   :  { %v7551_v33 = vpop.eup %6610  ;;  %v4658_v20 = vmul.f32 1.442695, %v4643_v51 }
 0xdee   :  { %v7553_v21 = vpop.eup %6612  ;;  %v3713_v54 = vpop.permute.xlu0 %3712  ;;  %v4666_v52 = vsel %vm1088_vm2, %v7551_v33, 0.0  ;;  %v3740_v41 = vrot.slane %v3732_v3, %v6888_v31  ;;  %v3747_v39 = vrot.slane %v3733_v22, %v6888_v31 }
 0xdef   :  { %v3721_v15 = vpop.permute.xlu1 %3720  ;;  %4667 = vadd.xlane.f32.xlu1 %v4666_v52  ;;  %v4663_v57 = vsel %vm1088_vm2, %v7553_v21, 0.0  ;;  %6622 = vpow2.f32 %v4658_v20 }
 0xdf0   :  { %v3748_v30 = vcombine.low %v3713_v54, %v3721_v15  ;;  %v3749_v59 = vcombine.high %v3713_v54, %v3721_v15  ;;  %4664 = vadd.xlane.f32.xlu0 %v4663_v57 }
 0xdf2   :  { %v7560_v44 = vpop.eup %6614  ;;  %v3756_v58 = vrot.slane %v3748_v30, %v6888_v31  ;;  %v3763_v28 = vrot.slane %v3749_v59, %v6888_v31 }
 0xdf3   :  { %v4672_v17 = vsel %vm1088_vm2, %v7560_v44, 0.0  ;;  %v7567_v60 = vpop.eup %6616  ;;  %v3711_v57 = vpop.permute.xlu1 %3710 }
 0xdf4   :  { %v3764_v61 = vcombine.low %v3740_v41, %v3756_v58  ;;  %v3765_v63 = vcombine.high %v3740_v41, %v3756_v58  ;;  %v3780_v0 = vcombine.low %v3747_v39, %v3763_v28  ;;  %v3781_v5 = vcombine.high %v3747_v39, %v3763_v28  ;;  %4673 = vadd.xlane.f32.xlu0 %v4672_v17 }
 0xdf5   :  { %v7569_v62 = vpop.eup %6618  ;;  %v4669_v53 = vsel %vm1088_vm2, %v7567_v60, 0.0 }
 0xdf6   :  { %v3772_v1 = vrot.slane %v3764_v61, %v6898_v38  ;;  %v3779_v2 = vrot.slane %v3765_v63, %v6898_v38  ;;  %v3788_v4 = vrot.slane %v3780_v0, %v6898_v38  ;;  %v3795_v6 = vrot.slane %v3781_v5, %v6898_v38  ;;  %v7579_v13 = vpop.eup %6620 }
 0xdf7   :  { %v4675_v47 = vsel %vm1088_vm2, %v7569_v62, 0.0  ;;  %v4678_v34 = vsel %vm1088_vm2, %v7579_v13, 0.0 }
 0xdf8   :  { %v3868_v10 = vcombine.low %v3772_v1, %v3779_v2  ;;  %v6033_v14 = vcombine.high %v3772_v1, %v3779_v2  ;;  %v3884_v42 = vcombine.low %v3788_v4, %v3795_v6  ;;  %v6034_v16 = vcombine.high %v3788_v4, %v3795_v6  ;;  %4676 = vadd.xlane.f32.xlu1 %v4675_v47 }
 0xdf9   :  { %4670 = vadd.xlane.f32.xlu0 %v4669_v53  ;;  %v7587_v7 = vpop.eup %6622 }
 0xdfa   :  { %v3875_v37 = vrot.slane %v3868_v10, %v6888_v31  ;;  %v3883_v25 = vrot.slane %v6033_v14, %v6888_v31  ;;  %v3891_v18 = vrot.slane %v3884_v42, %v6888_v31  ;;  %v3899_v40 = vrot.slane %v6034_v16, %v6888_v31 }
 0xdfb   :  { %v4681_v20 = vsel %vm1088_vm2, %v7587_v7, 0.0 }
 0xdfc   :  { %v3900_v46 = vcombine.low %v3875_v37, %v3883_v25  ;;  %v3916_v35 = vcombine.low %v3891_v18, %v3899_v40  ;;  %v3901_v24 = vcombine.high %v3875_v37, %v3883_v25  ;;  %v3917_v27 = vcombine.high %v3891_v18, %v3899_v40 }
 0xdfd   :  { %4679 = vadd.xlane.f32.xlu0 %v4678_v34 }
 0xdfe   :  { %v3908_v36 = vrot.slane %v3900_v46, %v6898_v38  ;;  %v3924_v51 = vrot.slane %v3916_v35, %v6898_v38  ;;  %v3915_v45 = vrot.slane %v3901_v24, %v6898_v38  ;;  %v3931_v3 = vrot.slane %v3917_v27, %v6898_v38 }
 0xe00   :  { %v3932_v22 = vcombine.low %v3908_v36, %v3924_v51  ;;  %v3933_v54 = vcombine.high %v3908_v36, %v3924_v51  ;;  %v3934_v52 = vcombine.low %v3915_v45, %v3931_v3  ;;  %v3935_v15 = vcombine.high %v3915_v45, %v3931_v3 }
 0xe01   :  { %4682 = vadd.xlane.f32.xlu0 %v4681_v20 }
 0xe02   :  { %6391 = vmatpush3.msra.mxu0 %v3932_v22  ;;  %6396 = vmatpush3.msra.mxu1 %v3933_v54 }
 0xe03   :  { %6400 = vmatprep.subr.mxu0 %v6742_v23  ;;  %6405 = vmatprep.subr.mxu1 %v6742_v23 }
 0xe09   :  { %3718 = vrot.lane.b32.xlu1 %v7376_v43, %s6743_s20 }
 0xe0d   :  { %3722 = vrot.lane.b32.xlu1 %v7384_v49, %s6743_s20 }
 0xe17   :  { %3714 = vrot.lane.b32.xlu0 %v7378_v48, %s6743_s20 }
 0xe78   :  { %v4662_v30 = vpop.xlane.xlu1 %4661 }
 0xe79   :  { %6624 = vrcp.f32 %v4662_v30 }
 0xe7c   :  { %v4668_v59 = vpop.xlane.xlu1 %4667 }
 0xe7d   :  { %v4665_v41 = vpop.xlane.xlu0 %4664  ;;  %6626 = vrcp.f32 %v4668_v59 }
 0xe7e   :  { %6628 = vrcp.f32 %v4665_v41 }
 0xe81   :  { %v4674_v39 = vpop.xlane.xlu0 %4673 }
 0xe83   :  { %v6625_v58 = vpop.eup %6624 }
 0xe84   :  { %v4692_v28 = vmul.f32 %v6625_v58, %v7547_v8 }
 0xe85   :  { %v4677_v61 = vpop.xlane.xlu1 %4676 }
 0xe86   :  { %v4671_v17 = vpop.xlane.xlu0 %4670  ;;  %6393 = vmatmul.mubr.msk.f32.vlgmr.msra.gmra.mrb[24].mxu0 %vm1088_vm2, %v4692_v28 }
 0xe87   :  { %v6627_v43 = vpop.eup %6626  ;;  %6630 = vrcp.f32 %v4671_v17  ;;  %6401 = vmatpush3.msra.mxu0 %v3934_v52  ;;  %6402 = vmatprep.mubr.msk.f32.mxu0 %vm6744_vm1, %v6742_v23 }
 0xe88   :  { %v6629_v48 = vpop.eup %6628  ;;  %v4694_v49 = vmul.f32 %v6627_v43, %v7551_v33  ;;  %6410 = vmatprep.subr.mxu0 %v6742_v23  ;;  %6632 = vrcp.f32 %v4674_v39 }
 0xe89   :  { %v4693_v63 = vmul.f32 %v6629_v48, %v7553_v21  ;;  %v3719_v8 = vpop.permute.xlu1 %3718  ;;  %6634 = vrcp.f32 %v4677_v61 }
 0xe8a   :  { %v4680_v0 = vpop.xlane.xlu0 %4679  ;;  %6403 = vmatmul.mubr.msk.f32.vlgmr.msra.gmra.mrb[26].mxu0 %vm1088_vm2, %v4694_v49  ;;  %v3800_v1 = vcombine.low %v3711_v57, %v3719_v8  ;;  %v3801_v2 = vcombine.high %v3711_v57, %v3719_v8 }
 0xe8b   :  { %6398 = vmatmul.mubr.msk.f32.vlgmr.msra.gmra.mrb[34].mxu1 %vm1088_vm2, %v4693_v63  ;;  %6412 = vmatprep.mubr.msk.f32.mxu0 %vm6744_vm1, %v6742_v23  ;;  %6636 = vrcp.f32 %v4680_v0 }
 0xe8c   :  { %6406 = vmatpush3.msra.mxu1 %v3935_v15  ;;  %6407 = vmatprep.mubr.msk.f32.mxu1 %vm6744_vm1, %v6742_v23  ;;  %v3808_v10 = vrot.slane %v3800_v1, %v6888_v31  ;;  %v3815_v14 = vrot.slane %v3801_v2, %v6888_v31 }
 0xe8d   :  { %6415 = vmatprep.subr.mxu1 %v6742_v23  ;;  %v3723_v4 = vpop.permute.xlu1 %3722 }
 0xe8e   :  { %v4683_v33 = vpop.xlane.xlu0 %4682 }
 0xe8f   :  { %6638 = vrcp.f32 %v4683_v33 }
 0xe91   :  { %v6631_v5 = vpop.eup %6630 }
 0xe92   :  { %v4695_v21 = vmul.f32 %v6631_v5, %v7567_v60  ;;  %v3715_v6 = vpop.permute.xlu0 %3714  ;;  %v6633_v54 = vpop.eup %6632 }
 0xe93   :  { %v3816_v47 = vcombine.low %v3715_v6, %v3723_v4  ;;  %v3817_v53 = vcombine.high %v3715_v6, %v3723_v4  ;;  %v6635_v59 = vpop.eup %6634  ;;  %v4696_v49 = vmul.f32 %v6633_v54, %v7560_v44 }
 0xe94   :  { %6408 = vmatmul.mubr.msk.f32.vlgmr.msra.gmra.mrb[36].mxu1 %vm1088_vm2, %v4695_v21  ;;  %v4697_v63 = vmul.f32 %v6635_v59, %v7569_v62 }
 0xe95   :  { %v3824_v42 = vrot.slane %v3816_v47, %v6888_v31  ;;  %v3831_v16 = vrot.slane %v3817_v53, %v6888_v31  ;;  %6417 = vmatprep.mubr.msk.f32.mxu1 %vm6744_vm1, %v6742_v23  ;;  %v6637_v58 = vpop.eup %6636 }
 0xe96   :  { %v4698_v33 = vmul.f32 %v6637_v58, %v7579_v13 }
 0xe97   :  { %v3832_v60 = vcombine.low %v3808_v10, %v3824_v42  ;;  %v3833_v37 = vcombine.high %v3808_v10, %v3824_v42  ;;  %v3848_v25 = vcombine.low %v3815_v14, %v3831_v16  ;;  %v3849_v18 = vcombine.high %v3815_v14, %v3831_v16 }
 0xe99   :  { %v3840_v40 = vrot.slane %v3832_v60, %v6898_v38  ;;  %v3847_v34 = vrot.slane %v3833_v37, %v6898_v38  ;;  %v3856_v46 = vrot.slane %v3848_v25, %v6898_v38  ;;  %v3863_v35 = vrot.slane %v3849_v18, %v6898_v38  ;;  %v6639_v48 = vpop.eup %6638 }
 0xe9a   :  { %v4699_v5 = vmul.f32 %v6639_v48, %v7587_v7 }
 0xe9b   :  { %v3936_v24 = vcombine.low %v3840_v40, %v3847_v34  ;;  %v6035_v27 = vcombine.high %v3840_v40, %v3847_v34  ;;  %v3952_v36 = vcombine.low %v3856_v46, %v3863_v35  ;;  %v6036_v51 = vcombine.high %v3856_v46, %v3863_v35 }
 0xe9d   :  { %v3943_v45 = vrot.slane %v3936_v24, %v6888_v31  ;;  %v3951_v3 = vrot.slane %v6035_v27, %v6888_v31  ;;  %v3959_v20 = vrot.slane %v3952_v36, %v6888_v31  ;;  %v3967_v22 = vrot.slane %v6036_v51, %v6888_v31 }
 0xe9f   :  { %v3968_v52 = vcombine.low %v3943_v45, %v3951_v3  ;;  %v3984_v15 = vcombine.low %v3959_v20, %v3967_v22  ;;  %v3969_v57 = vcombine.high %v3943_v45, %v3951_v3  ;;  %v3985_v30 = vcombine.high %v3959_v20, %v3967_v22 }
 0xea1   :  { %v3976_v41 = vrot.slane %v3968_v52, %v6898_v38  ;;  %v3992_v39 = vrot.slane %v3984_v15, %v6898_v38  ;;  %v3983_v28 = vrot.slane %v3969_v57, %v6898_v38  ;;  %v3999_v17 = vrot.slane %v3985_v30, %v6898_v38 }
 0xea3   :  { %v4000_v61 = vcombine.low %v3976_v41, %v3992_v39  ;;  %v4001_v43 = vcombine.high %v3976_v41, %v3992_v39  ;;  %v4002_v0 = vcombine.low %v3983_v28, %v3999_v17  ;;  %v4003_v8 = vcombine.high %v3983_v28, %v3999_v17 }
 0xea5   :  { %6411 = vmatpush3.msra.mxu0 %v4000_v61  ;;  %6416 = vmatpush3.msra.mxu1 %v4001_v43 }
 0xea6   :  { %6413 = vmatmul.mubr.msk.f32.vlgmr.msra.gmra.mrb[28].mxu0 %vm1088_vm2, %v4696_v49  ;;  %6418 = vmatmul.mubr.msk.f32.vlgmr.msra.gmra.mrb[38].mxu1 %vm1088_vm2, %v4697_v63 }
 0xea7   :  { %6420 = vmatprep.subr.mxu0 %v6742_v23  ;;  %6425 = vmatprep.subr.mxu1 %v6742_v23 }
 0xea8   :  { %6421 = vmatpush3.msra.mxu0 %v4002_v0  ;;  %6426 = vmatpush3.msra.mxu1 %v4003_v8 }
 0xea9   :  { %6422 = vmatprep.mubr.msk.f32.mxu0 %vm6744_vm1, %v6742_v23  ;;  %6427 = vmatprep.mubr.msk.f32.mxu1 %vm6744_vm1, %v6742_v23 }
 0xeaa   :  { %6423 = vmatmul.mubr.msk.f32.vlgmr.msra.gmra.mrb[30].mxu0 %vm1088_vm2, %v4698_v33  ;;  %6428 = vmatmul.mubr.msk.f32.vlgmr.msra.gmra.mrb[40].mxu1 %vm1088_vm2, %v4699_v5 }
 0xf59   :  { %v4769_v44 = vpop.f32.mrb[24].mxu0 }
 0xf5a   :  { %v6394_v62 = vpop.f32.mrb[25].mxu0 }
 0xf5d   :  { %v4915_v1 = vpop.f32.mrb[26].mxu0 }
 0xf5e   :  { %v4842_v2 = vpop.f32.mrb[34].mxu1  ;;  %v5284_v21 = vcombine.low %v4769_v44, %v4915_v1  ;;  %v5285_v13 = vcombine.high %v4769_v44, %v4915_v1  ;;  %v6404_v4 = vpop.f32.mrb[27].mxu0 }
 0xf5f   :  { %v6399_v7 = vpop.f32.mrb[35].mxu1 }
 0xf60   :  { %v5292_v14 = vrot.slane %v5284_v21, %v6888_v31  ;;  %v5299_v23 = vrot.slane %v5285_v13, %v6888_v31 }
 0xf67   :  { %v4988_v6 = vpop.f32.mrb[36].mxu1 }
 0xf68   :  { %v5300_v47 = vcombine.low %v4842_v2, %v4988_v6  ;;  %v5301_v53 = vcombine.high %v4842_v2, %v4988_v6  ;;  %v6409_v10 = vpop.f32.mrb[37].mxu1 }
 0xf6a   :  { %v5308_v42 = vrot.slane %v5300_v47, %v6888_v31  ;;  %v5315_v16 = vrot.slane %v5301_v53, %v6888_v31 }
 0xf6c   :  { %v5316_v60 = vcombine.low %v5292_v14, %v5308_v42  ;;  %v5317_v37 = vcombine.high %v5292_v14, %v5308_v42  ;;  %v5332_v25 = vcombine.low %v5299_v23, %v5315_v16  ;;  %v5333_v18 = vcombine.high %v5299_v23, %v5315_v16  ;;  %v6065_v14 = vld [vmem:[%s7816_s3 + $0x20] sm:$0xff]  ;;  %v6066_v23 = vld [vmem:[%s7816_s3 + $0x28] sm:$0xff] }
 0xf6d   :  { %v6519_v42 = vpack.c.bf16 %v6066_v23, %v6065_v14 }
 0xf6e   :  { %v5324_v40 = vrot.slane %v5316_v60, %v6898_v38  ;;  %v5331_v34 = vrot.slane %v5317_v37, %v6898_v38  ;;  %v5340_v46 = vrot.slane %v5332_v25, %v6898_v38  ;;  %v5347_v35 = vrot.slane %v5333_v18, %v6898_v38 }
 0xf6f   :  { %6520 = vmatprep.subr.bf16.mxu0 %v6519_v42 }
 0xf70   :  { %v5420_v24 = vcombine.low %v5324_v40, %v5331_v34  ;;  %v6061_v27 = vcombine.high %v5324_v40, %v5331_v34  ;;  %v5436_v36 = vcombine.low %v5340_v46, %v5347_v35  ;;  %v6062_v51 = vcombine.high %v5340_v46, %v5347_v35  ;;  %6522 = vmatpush3.bf16.msra.mxu0 %v6519_v42  ;;  %v6067_v35 = vld [vmem:[%s7816_s3 + $0x30] sm:$0xff] }
 0xf72   :  { %v5427_v45 = vrot.slane %v5420_v24, %v6888_v31  ;;  %v5435_v3 = vrot.slane %v6061_v27, %v6888_v31  ;;  %v5443_v20 = vrot.slane %v5436_v36, %v6888_v31  ;;  %v5451_v22 = vrot.slane %v6062_v51, %v6888_v31  ;;  %v6068_v24 = vld [vmem:[%s7816_s3 + $0x38] sm:$0xff] }
 0xf73   :  { %v6523_v27 = vpack.c.bf16 %v6068_v24, %v6067_v35  ;;  %v6077_v35 = vld [vmem:[%s7818_s5 + $0x40] sm:$0xff]  ;;  %v6078_v24 = vld [vmem:[%s7818_s5 + $0x48] sm:$0xff] }
 0xf74   :  { %v5452_v54 = vcombine.low %v5427_v45, %v5435_v3  ;;  %v5468_v52 = vcombine.low %v5443_v20, %v5451_v22  ;;  %v5453_v15 = vcombine.high %v5427_v45, %v5435_v3  ;;  %v5469_v57 = vcombine.high %v5443_v20, %v5451_v22 }
 0xf75   :  { %6524 = vmatprep.subr.bf16.mxu0 %v6523_v27 }
 0xf76   :  { %v7664_v30 = vrot.slane %v5452_v54, %v6898_v38  ;;  %v7667_v59 = vrot.slane %v5468_v52, %v6898_v38  ;;  %v5467_v41 = vrot.slane %v5453_v15, %v6898_v38  ;;  %v5483_v39 = vrot.slane %v5469_v57, %v6898_v38  ;;  %6526 = vmatpush3.bf16.msra.mxu0 %v6523_v27  ;;  %v6079_v27 = vld [vmem:[%s7818_s5 + $0x50] sm:$0xff] }
 0xf78   :  { %v5485_v58 = vcombine.high %v7664_v30, %v7667_v59  ;;  %v5484_v28 = vcombine.low %v7664_v30, %v7667_v59  ;;  %v5486_v17 = vcombine.low %v5467_v41, %v5483_v39  ;;  %v5487_v61 = vcombine.high %v5467_v41, %v5483_v39  ;;  %v7723_v30 = vld [vmem:[%s7819_s6 + $0x8] sm:$0xff] }
 0xf79   :  { %v5061_v43 = vpop.f32.mrb[28].mxu0  ;;  %v5134_v48 = vpop.f32.mrb[38].mxu1  ;;  %v5594_v59 = vrot.slane %v7723_v30, %v2679_v19 }
 0xf7a   :  { %5558 = vrot.lane.b32.xlu0 %v5485_v58, %s6734_s12  ;;  %v6414_v49 = vpop.f32.mrb[29].mxu0  ;;  %v6419_v63 = vpop.f32.mrb[39].mxu1 }
 0xf7d   :  { %v5207_v0 = vpop.f32.mrb[30].mxu0  ;;  %v5280_v8 = vpop.f32.mrb[40].mxu1 }
 0xf7e   :  { %v5352_v33 = vcombine.low %v5061_v43, %v5207_v0  ;;  %v5353_v5 = vcombine.high %v5061_v43, %v5207_v0  ;;  %v5368_v44 = vcombine.low %v5134_v48, %v5280_v8  ;;  %v5369_v62 = vcombine.high %v5134_v48, %v5280_v8  ;;  %5566 = vrot.lane.b32.xlu0 %v5486_v17, %s6736_s0  ;;  %v6424_v1 = vpop.f32.mrb[31].mxu0  ;;  %v6429_v2 = vpop.f32.mrb[41].mxu1 }
 0xf80   :  { %v5360_v21 = vrot.slane %v5352_v33, %v6888_v31  ;;  %v5367_v13 = vrot.slane %v5353_v5, %v6888_v31  ;;  %v5376_v4 = vrot.slane %v5368_v44, %v6888_v31  ;;  %v5383_v7 = vrot.slane %v5369_v62, %v6888_v31 }
 0xf82   :  { %v5384_v6 = vcombine.low %v5360_v21, %v5376_v4  ;;  %v5385_v47 = vcombine.high %v5360_v21, %v5376_v4  ;;  %v5400_v53 = vcombine.low %v5367_v13, %v5383_v7  ;;  %v5401_v10 = vcombine.high %v5367_v13, %v5383_v7  ;;  %5574 = vrot.lane.b32.xlu0 %v5487_v61, %s6747_s21 }
 0xf84   :  { %v5392_v16 = vrot.slane %v5384_v6, %v6898_v38  ;;  %v5399_v60 = vrot.slane %v5385_v47, %v6898_v38  ;;  %v5408_v37 = vrot.slane %v5400_v53, %v6898_v38  ;;  %v5415_v25 = vrot.slane %v5401_v10, %v6898_v38 }
 0xf86   :  { %v5488_v18 = vcombine.low %v5392_v16, %v5399_v60  ;;  %v6063_v40 = vcombine.high %v5392_v16, %v5399_v60  ;;  %v5504_v34 = vcombine.low %v5408_v37, %v5415_v25  ;;  %v6064_v46 = vcombine.high %v5408_v37, %v5415_v25  ;;  %v6072_v25 = vld [vmem:[%s7817_s4 + $0x28] sm:$0xff] }
 0xf88   :  { %v5495_v36 = vrot.slane %v5488_v18, %v6888_v31  ;;  %v5503_v51 = vrot.slane %v6063_v40, %v6888_v31  ;;  %v5511_v45 = vrot.slane %v5504_v34, %v6888_v31  ;;  %v5519_v3 = vrot.slane %v6064_v46, %v6888_v31  ;;  %v6073_v40 = vld [vmem:[%s7817_s4 + $0x30] sm:$0xff]  ;;  %v6074_v34 = vld [vmem:[%s7817_s4 + $0x38] sm:$0xff] }
 0xf89   :  { %v6531_v46 = vpack.c.bf16 %v6074_v34, %v6073_v40 }
 0xf8a   :  { %v5520_v20 = vcombine.low %v5495_v36, %v5503_v51  ;;  %v5536_v22 = vcombine.low %v5511_v45, %v5519_v3  ;;  %v5521_v54 = vcombine.high %v5495_v36, %v5503_v51  ;;  %v5537_v52 = vcombine.high %v5511_v45, %v5519_v3  ;;  %v6080_v51 = vld [vmem:[%s7818_s5 + $0x58] sm:$0xff]  ;;  %v6081_v3 = vld [vmem:[%s7818_s5 + $0x60] sm:$0xff] }
 0xf8b   :  { %v6535_v36 = vpack.c.bf16 %v6078_v24, %v6077_v35  ;;  %v6539_v45 = vpack.c.bf16 %v6080_v51, %v6079_v27  ;;  %v5933_v35 = vrot.slane %v7723_v30, %v3018_v11  ;;  %v5939_v51 = vrot.slane %v7723_v30, %v3024_v55 }
 0xf8c   :  { %v5528_v15 = vrot.slane %v5520_v20, %v6898_v38  ;;  %v5544_v57 = vrot.slane %v5536_v22, %v6898_v38  ;;  %v5535_v41 = vrot.slane %v5521_v54, %v6898_v38  ;;  %v5551_v39 = vrot.slane %v5537_v52, %v6898_v38  ;;  %v6082_v20 = vld [vmem:[%s7818_s5 + $0x68] sm:$0xff] }
 0xf8d   :  { %6536 = vmatprep.subr.bf16.mxu0 %v6535_v36  ;;  %v6543_v22 = vpack.c.bf16 %v6082_v20, %v6081_v3 }
 0xf8e   :  { %v5553_v58 = vcombine.high %v5528_v15, %v5544_v57  ;;  %v5552_v17 = vcombine.low %v5528_v15, %v5544_v57  ;;  %v5554_v61 = vcombine.low %v5535_v41, %v5551_v39  ;;  %v5555_v43 = vcombine.high %v5535_v41, %v5551_v39 }
 0xf90   :  { %5560 = vrot.lane.b32.xlu1 %v5553_v58, %s6734_s12  ;;  %v5707_v58 = vrot.slane %v7723_v30, %v2793_v56  ;;  %v6083_v56 = vld [vmem:[%s7818_s5 + $0x70] sm:$0xff] }
 0xf94   :  { %5568 = vrot.lane.b32.xlu1 %v5554_v61, %s6736_s0 }
 0xf98   :  { %5576 = vrot.lane.b32.xlu1 %v5555_v43, %s6747_s21  ;;  %v5713_v43 = vrot.slane %v7723_v30, %v2799_v12  ;;  %v5724_v12 = vrot.slane %v7723_v30, %v2809_v26 }
 0xfec   :  { %v5559_v31 = vpop.permute.xlu0 %5558 }
 0xfed   :  { %v5580_v49 = vsel %vm1088_vm2, %v5484_v28, %v5559_v31 }
 0xff0   :  { %v5567_v48 = vpop.permute.xlu0 %5566 }
 0xff1   :  { %v5582_v63 = vsel %vm2667_vm3, %v5580_v49, %v5567_v48 }
 0xff4   :  { %v5575_v38 = vpop.permute.xlu0 %5574 }
 0xff5   :  { %v5584_v0 = vsel %vm2670_vm4, %v5582_v63, %v5575_v38 }
 0xff6   :  { %6438 = vmatprep.mubr.msk.f32.mxu0 %vm74_vm0, %v5584_v0 }
0x1002   :  { %v5561_v8 = vpop.permute.xlu1 %5560 }
0x1003   :  { %v5581_v5 = vsel %vm1088_vm2, %v5552_v17, %v5561_v8  ;;  %v6084_v8 = vld [vmem:[%s7818_s5 + $0x78] sm:$0xff]  ;;  %s6748_s5 = smov [#allocation7]  }
0x1004   :  { %s5949_s1 = sshll.u32 %s6748_s5, 4  ;;  %s5950_s1 = int_to_ptr.vmem [resolvable:$true] %s5949_s1 }
0x1005   :  { %s6704_s3 = scalar_lea.vmem %s5950_s1, 256  ;;  %p6709_p3 = scmp.lt.s32.totalorder %s5950_s1, %s5950_s1 }
0x1006   :  { %v5569_v33 = vpop.permute.xlu1 %5568  ;;  %p6705_p2 = scmp.ne.s32.totalorder %s5950_s1, %s6704_s3  ;;  %p6710_p4 = scmp.lt.s32.totalorder %s6704_s3, %s6704_s3 }
0x1007   :  { %v5583_v44 = vsel %vm2667_vm3, %v5581_v5, %v5569_v33  ;;  %v6547_v33 = vpack.c.bf16 %v6084_v8, %v6083_v56 }
0x1008   :  { %p6711_p5 = por %p6710_p4, %p6709_p3 }
0x100a   :  { %v5577_v62 = vpop.permute.xlu1 %5576  ;;  %p6712_p6 = pnand %p6711_p5, %p6705_p2 }
0x100b   :  { %v5585_v1 = vsel %vm2670_vm4, %v5583_v44, %v5577_v62 }
0x100c   :  { %6439 = vmatmul.mubr.msk.f32.vlgmr.msra.gmra.mrb[32].mxu0 %vm74_vm0, %v5585_v1 }
0x100d   :  { %6538 = vmatpush3.bf16.msra.mxu0 %v6535_v36 }
0x100e   :  { %6540 = vmatprep.subr.bf16.mxu0 %v6539_v45 }
0x1011   :  { %6542 = vmatpush3.bf16.msra.mxu0 %v6539_v45 }
0x1012   :  { %6544 = vmatprep.subr.bf16.mxu0 %v6543_v22 }
0x1015   :  { %6546 = vmatpush3.bf16.msra.mxu0 %v6543_v22 }
0x1016   :  { %6548 = vmatprep.subr.bf16.mxu0 %v6547_v33 }
0x1019   :  { %6550 = vmatpush3.bf16.msra.mxu0 %v6547_v33 }
0x10df   :  { %v6440_v28 = vpop.f32.mrb[32].mxu0 }
0x10e0   :  { %v5673_v2 = vadd.f32 %v6440_v28, %v5594_v59  ;;  %v5667_v21 = vpop.f32.mrb[33].mxu0 }
0x10e1   :  { %v5668_v13 = vadd.f32 %v5667_v21, %v5594_v59 }
0x10e2   :  { %v5677_v4 = vadd.f32 %v5673_v2, %v7337_v32  ;;  %v5820_v2 = vrot.slane %v7723_v30, %v2904_v50 }
0x10e3   :  { %v5676_v7 = vadd.f32 %v5668_v13, %v7335_v29  ;;  %v6071_v29 = vld [vmem:[%s7817_s4 + $0x20] sm:$0xff] }
0x10e4   :  { %v5681_v6 = vsel %vm74_vm0, %v5677_v4, 0.0  ;;  %v6527_v18 = vpack.c.bf16 %v6072_v25, %v6071_v29 }
0x10e5   :  { %5682 = vadd.xlane.f32.xlu1 %v5681_v6  ;;  %v5678_v47 = vsel %vm74_vm0, %v5676_v7, 0.0 }
0x10e6   :  { %5679 = vadd.xlane.f32.xlu0 %v5678_v47  ;;  %6528 = vmatprep.subr.bf16.mxu1 %v6527_v18 }
0x10e7   :  { %6530 = vmatpush3.bf16.msra.mxu1 %v6527_v18 }
0x10e8   :  { %6532 = vmatprep.subr.bf16.mxu1 %v6531_v46 }
0x10eb   :  { %6534 = vmatpush3.bf16.msra.mxu1 %v6531_v46 }
0x1172   :  { %v5683_v53 = vpop.xlane.xlu1 %5682 }
0x1173   :  { %v5685_v10 = vmul.f32 0.03125, %v5683_v53  ;;  %v5680_v14 = vpop.xlane.xlu0 %5679 }
0x1174   :  { %v5684_v23 = vmul.f32 0.03125, %v5680_v14 }
0x1175   :  { %v5687_v42 = vsub.f32 %v5677_v4, %v5685_v10 }
0x1176   :  { %v5686_v19 = vsub.f32 %v5676_v7, %v5684_v23 }
0x1177   :  { %v5689_v37 = vmul.f32 %v5687_v42, %v5687_v42 }
0x1178   :  { %v5688_v16 = vmul.f32 %v5686_v19, %v5686_v19 }
0x1179   :  { %v5693_v32 = vsel %vm74_vm0, %v5689_v37, 0.0 }
0x117a   :  { %v5690_v60 = vsel %vm74_vm0, %v5688_v16, 0.0 }
0x117b   :  { %5691 = vadd.xlane.f32.xlu0 %v5690_v60 }
0x117f   :  { %5694 = vadd.xlane.f32.xlu0 %v5693_v32 }
0x1208   :  { %v5692_v54 = vpop.xlane.xlu0 %5691 }
0x1209   :  { %v5696_v52 = vmul.f32 0.03125, %v5692_v54 }
0x120b   :  { %v5698_v15 = vadd.f32 1e-05, %v5696_v52 }
0x120c   :  { %v5695_v57 = vpop.xlane.xlu0 %5694 }
0x120d   :  { %6640 = vrsqrt.f32 %v5698_v15  ;;  %v5697_v41 = vmul.f32 0.03125, %v5695_v57 }
0x120f   :  { %v5699_v39 = vadd.f32 1e-05, %v5697_v41 }
0x1211   :  { %6642 = vrsqrt.f32 %v5699_v39 }
0x1217   :  { %v6641_v17 = vpop.eup %6640 }
0x1218   :  { %v5702_v61 = vmul.f32 %v6641_v17, %v5686_v19 }
0x121a   :  { %v5708_v31 = vmul.f32 %v5707_v58, %v5702_v61 }
0x121b   :  { %v6643_v48 = vpop.eup %6642 }
0x121c   :  { %v5703_v49 = vmul.f32 %v6643_v48, %v5687_v42  ;;  %v5714_v63 = vadd.f32 %v5713_v43, %v5708_v31 }
0x121e   :  { %v5709_v38 = vmul.f32 %v5707_v58, %v5703_v49  ;;  %6449 = vmatprep.mubr.msk.f32.mxu1 %vm74_vm0, %v5714_v63 }
0x1220   :  { %v5715_v0 = vadd.f32 %v5713_v43, %v5709_v38 }
0x1222   :  { %6450 = vmatmul.mubr.msk.f32.vlgmr.msra.gmra.mrb[42].mxu1 %vm74_vm0, %v5715_v0 }
0x12f5   :  { %v6451_v5 = vpop.f32.mrb[42].mxu1 }
0x12f6   :  { %v5803_v44 = vadd.f32 %v6451_v5, %v5724_v12  ;;  %v5797_v62 = vpop.f32.mrb[43].mxu1 }
0x12f7   :  { %v5798_v1 = vadd.f32 %v5797_v62, %v5724_v12 }
0x12f8   :  { %v5807_v28 = vmax.f32 %v5803_v44, 0.0 }
0x12f9   :  { %v5806_v59 = vmax.f32 %v5798_v1, 0.0 }
0x12fb   :  { %6468 = vmatprep.mubr.msk.f32.mxu0 %vm2906_vm5, %v5806_v59 }
0x12fc   :  { %6469 = vmatmul.mubr.msk.f32.vlgmr.msra.gmra.mrb[34].mxu0 %vm2906_vm5, %v5807_v28 }
0x13cf   :  { %v6470_v21 = vpop.f32.mrb[34].mxu0 }
0x13d0   :  { %v5899_v13 = vadd.f32 %v6470_v21, %v5820_v2  ;;  %v5893_v4 = vpop.f32.mrb[35].mxu0 }
0x13d1   :  { %v5894_v7 = vadd.f32 %v5893_v4, %v5820_v2 }
0x13d2   :  { %v5903_v6 = vadd.f32 %v5899_v13, %v5715_v0 }
0x13d3   :  { %v5902_v26 = vadd.f32 %v5894_v7, %v5714_v63 }
0x13d4   :  { %v5907_v47 = vsel %vm74_vm0, %v5903_v6, 0.0 }
0x13d5   :  { %5908 = vadd.xlane.f32.xlu0 %v5907_v47  ;;  %v5904_v53 = vsel %vm74_vm0, %v5902_v26, 0.0 }
0x13d6   :  { %5905 = vadd.xlane.f32.xlu1 %v5904_v53 }
0x1462   :  { %v5909_v10 = vpop.xlane.xlu0 %5908 }
0x1463   :  { %v5911_v14 = vmul.f32 0.03125, %v5909_v10  ;;  %v5906_v23 = vpop.xlane.xlu1 %5905 }
0x1464   :  { %v5910_v42 = vmul.f32 0.03125, %v5906_v23 }
0x1465   :  { %v5913_v19 = vsub.f32 %v5903_v6, %v5911_v14 }
0x1466   :  { %v5912_v16 = vsub.f32 %v5902_v26, %v5910_v42 }
0x1467   :  { %v5915_v60 = vmul.f32 %v5913_v19, %v5913_v19 }
0x1468   :  { %v5914_v50 = vmul.f32 %v5912_v16, %v5912_v16 }
0x1469   :  { %v5919_v37 = vsel %vm74_vm0, %v5915_v60, 0.0 }
0x146a   :  { %5920 = vadd.xlane.f32.xlu0 %v5919_v37  ;;  %v5916_v32 = vsel %vm74_vm0, %v5914_v50, 0.0 }
0x146b   :  { %5917 = vadd.xlane.f32.xlu1 %v5916_v32 }
0x14f7   :  { %v5921_v29 = vpop.xlane.xlu0 %5920 }
0x14f8   :  { %v5923_v25 = vmul.f32 0.03125, %v5921_v29  ;;  %v5918_v18 = vpop.xlane.xlu1 %5917 }
0x14f9   :  { %v5922_v40 = vmul.f32 0.03125, %v5918_v18 }
0x14fa   :  { %v5925_v34 = vadd.f32 1e-05, %v5923_v25 }
0x14fb   :  { %v5924_v46 = vadd.f32 1e-05, %v5922_v40 }
0x14fc   :  { %6644 = vrsqrt.f32 %v5925_v34 }
0x14fd   :  { %6646 = vrsqrt.f32 %v5924_v46 }
0x1506   :  { %v6645_v24 = vpop.eup %6644 }
0x1507   :  { %v6647_v27 = vpop.eup %6646  ;;  %v5929_v36 = vmul.f32 %v6645_v24, %v5913_v19 }
0x1508   :  { %v5928_v45 = vmul.f32 %v6647_v27, %v5912_v16 }
0x1509   :  { %v5935_v3 = vmul.f32 %v5933_v35, %v5929_v36 }
0x150a   :  { %v5934_v20 = vmul.f32 %v5933_v35, %v5928_v45 }
0x150b   :  { %v5941_v22 = vadd.f32 %v5939_v51, %v5935_v3 }
0x150c   :  { %v5940_v54 = vadd.f32 %v5939_v51, %v5934_v20 }
0x150d   :  { %5943 = vst.msk [vmem:[#allocation7 + $0x8] sm:$0xff] %vm74_vm0, %v5941_v22 }
0x150e   :  { %5942 = vst.msk [vmem:[#allocation7] sm:$0xff] %vm74_vm0, %v5940_v54 }
0x150f   :  { %6715 = shalt.err (!%p6712_p6)
}
0x1510   :  { %s6716_s21 = scalar_lea.hbm %s7820_s7, 256 }
0x1511   :  { %p6717_p7 = scmp.ne.s32.totalorder %s7820_s7, %s6716_s21  ;;  %p6720_p8 = scmp.lt.u32.totalorder %s6716_s21, %s7820_s7 }
0x1513   :  { %p6722_p9 = pnand %p6720_p8, %p6717_p7 }
0x1515   :  { %6725 = shalt.err (!%p6722_p9)
}
0x1516   :  { %5955 = dma.vmem_to_hbm [thread:$0]  %s5950_s1, 256, %s7820_s7, [#allocation4], %s6733_s11, %s6733_s11, %s6734_s12  }
0x1517   :  { %6730 = dma.done.wait [#allocation4], 256  }
0x1518   :  { %6731 = vsyncadd [#allocation4], 4294967040 }
0x1519   :  { %5959 = vsyncpa [#allocation3], 1 }
0x151a   :  { %5960 = vsyncpa [#allocation6], 1 }
0x151b   :  { %5961 = vsyncpa [#allocation4], 1 }

</bundles_post_ra>
